<compile_context>
chip_gen: v7x
topology: tpu7x:2x2x1
jax: 0.10.0
libtpu: 0.0.40
codegen_flags: <defaults>
</compile_context>

<pallas_src>
import functools

import jax
import jax.numpy as jnp
from jax.experimental import pallas as pl
from jax.experimental.pallas import tpu as pltpu

HIDDEN = 200      # hidden_layer in the PyTorch module
DIM_X = 32        # dimension_x (module-level global in nn.py) -- chosen small
DIM_Y = 16        # dimension_y (module-level global in nn.py) -- chosen small
NEG_SLOPE = 0.01  # default negative_slope of F.leaky_relu

H_PAD = 256       # hidden padded to a clean multiple of the 128-lane vreg
Y_PAD = 128       # output padded to one full 128-lane register -> unmasked stores


def _leaky_relu(v):
    return jnp.where(v > 0, v, NEG_SLOPE * v)


def mlp_kernel(x_ref,
               w1_ref, b1_ref,
               w2_ref, b2_ref,
               w3_ref, b3_ref,
               w4_ref, b4_ref,
               o_ref, *, act_dtype):
    # Whole hot path (4 matmuls + 3 leaky_relu + bias adds) runs in VMEM on the MXU/VPU.
    # MXU inputs are the weights' dtype (bf16 by default); accumulation + bias add stay
    # f32; the activation runs in act_dtype (bf16 on v6e/v7x, f32 if requested for v5e).
    cdt = w1_ref.dtype

    def layer(h_prev, w_ref, b_ref):
        acc = jnp.dot(h_prev, w_ref[...], preferred_element_type=jnp.float32)
        acc = acc + b_ref[...]                       # f32 bias add on the accumulator
        return _leaky_relu(acc.astype(act_dtype)).astype(cdt)

    y = layer(x_ref[...].astype(cdt), w1_ref, b1_ref)
    y = layer(y, w2_ref, b2_ref)
    y = layer(y, w3_ref, b3_ref)
    acc = jnp.dot(y, w4_ref[...], preferred_element_type=jnp.float32) + b4_ref[...]
    o_ref[...] = acc.astype(o_ref.dtype)             # lane-dense bf16 writeback


def _pad2(a, rows, cols):
    r, c = a.shape
    return jnp.pad(a, ((0, rows - r), (0, cols - c)))


def prepare_params(params, *, compute_dtype=jnp.bfloat16):
    """One-time zero-padding to lane-clean shapes + MXU dtype cast.

    Hoisted out of the jitted forward so the ~0.7 MB of pad/cast traffic is not
    paid on every call. Zero padding keeps the math exact; biases stay f32.
    """
    return dict(
        w1=_pad2(params["w1"], DIM_X, H_PAD).astype(compute_dtype),
        w2=_pad2(params["w2"], H_PAD, H_PAD).astype(compute_dtype),
        w3=_pad2(params["w3"], H_PAD, H_PAD).astype(compute_dtype),
        w4=_pad2(params["w4"], H_PAD, Y_PAD).astype(compute_dtype),
        b1=_pad2(params["b1"], 1, H_PAD).astype(jnp.float32),
        b2=_pad2(params["b2"], 1, H_PAD).astype(jnp.float32),
        b3=_pad2(params["b3"], 1, H_PAD).astype(jnp.float32),
        b4=_pad2(params["b4"], 1, Y_PAD).astype(jnp.float32),
    )


def _choose_tile(B, batch_tile):
    """Pick the batch tile: big tiles for large B (amortise per-step overhead),
    but always >= 2 balanced grid steps when possible so both v7x TCs get work."""
    if B <= 8:
        return 8
    if B <= batch_tile:
        half = -(-B // 2)                 # ceil(B / 2)
        return min(batch_tile, max(8, ((half + 7) // 8) * 8))
    return batch_tile


@functools.partial(jax.jit, static_argnames=("batch_tile", "bf16_activations"))
def generator_x_y_forward(x, prepared, *, batch_tile=512, bf16_activations=True):
    """x: (B, DIM_X) float32.  prepared: output of prepare_params().

    batch_tile: 512 (sweep 256/512/1024 for your batch size); small B auto-splits
                into 2 balanced tiles for v7x megacore.
    bf16_activations: keep True on v6e/v7x (bf16 VPU); set False on v5e.
    """
    B, dx = x.shape
    assert dx == DIM_X

    cdt = prepared["w1"].dtype
    act_dtype = cdt if bf16_activations else jnp.float32

    tile = _choose_tile(B, batch_tile)
    num_tiles = max(1, -(-B // tile))
    Bp = num_tiles * tile
    # Pad the batch with zero rows (computed and then discarded by the final slice).
    x_p = jnp.pad(x, ((0, Bp - B), (0, 0)))

    # Weights/biases resident every tile: constant index_map -> no per-step re-DMA.
    full = lambda a: pl.BlockSpec(a.shape, lambda i: (0, 0))

    weight_bytes = sum(int(v.size) * v.dtype.itemsize for v in prepared.values())
    out_itemsize = jnp.dtype(cdt).itemsize
    cost = pl.CostEstimate(
        flops=2 * Bp * (DIM_X * H_PAD + 2 * H_PAD * H_PAD + H_PAD * Y_PAD),
        transcendentals=0,
        bytes_accessed=int(x_p.size) * x.dtype.itemsize + weight_bytes
        + Bp * Y_PAD * out_itemsize,
    )

    kernel = functools.partial(mlp_kernel, act_dtype=act_dtype)

    out = pl.pallas_call(
        kernel,
        # bf16 lane-dense output: unmasked full-lane stores, half the HBM writeback.
        out_shape=jax.ShapeDtypeStruct((Bp, Y_PAD), cdt),
        grid_spec=pltpu.PrefetchScalarGridSpec(
            num_scalar_prefetch=0,
            grid=(num_tiles,),
            in_specs=[
                pl.BlockSpec((tile, DIM_X), lambda i: (i, 0)),
                full(prepared["w1"]), full(prepared["b1"]),
                full(prepared["w2"]), full(prepared["b2"]),
                full(prepared["w3"]), full(prepared["b3"]),
                full(prepared["w4"]), full(prepared["b4"]),
            ],
            out_specs=pl.BlockSpec((tile, Y_PAD), lambda i: (i, 0)),
        ),
        compiler_params=pltpu.CompilerParams(
            # Independent batch tiles: megacore-shardable across the 2 TCs on v7x.
            dimension_semantics=("parallel",),
        ),
        cost_estimate=cost,
    )(x_p, prepared["w1"], prepared["b1"], prepared["w2"], prepared["b2"],
      prepared["w3"], prepared["b3"], prepared["w4"], prepared["b4"])

    # Slice back to the real batch/output and return f32 like the PyTorch module.
    return out[:B, :DIM_Y].astype(jnp.float32)


def init_params(key):
    """Deterministic init mimicking nn.Linear's U(-1/sqrt(fan_in), 1/sqrt(fan_in))."""
    def linear(key, fan_in, fan_out):
        kw, kb = jax.random.split(key)
        bound = 1.0 / jnp.sqrt(float(fan_in))
        w = jax.random.uniform(kw, (fan_in, fan_out), jnp.float32, -bound, bound)
        b = jax.random.uniform(kb, (1, fan_out), jnp.float32, -bound, bound)
        return w, b

    k1, k2, k3, k4 = jax.random.split(key, 4)
    w1, b1 = linear(k1, DIM_X, HIDDEN)
    w2, b2 = linear(k2, HIDDEN, HIDDEN)
    w3, b3 = linear(k3, HIDDEN, HIDDEN)
    w4, b4 = linear(k4, HIDDEN, DIM_Y)
    return dict(w1=w1, b1=b1, w2=w2, b2=b2, w3=w3, b3=b3, w4=w4, b4=b4)


def reference_forward(x, p):
    y = _leaky_relu(x @ p["w1"] + p["b1"])
    y = _leaky_relu(y @ p["w2"] + p["b2"])
    y = _leaky_relu(y @ p["w3"] + p["b3"])
    return y @ p["w4"] + p["b4"]


if __name__ == "__main__":
    key = jax.random.PRNGKey(0)
    kx, kp = jax.random.split(key)
    batch = 300  # not a tile multiple -> exercises pad path; splits into 2 grid steps
    x = jax.random.normal(kx, (batch, DIM_X), jnp.float32)
    params = init_params(kp)
    ref = reference_forward(x, params)

    # Fast path (all generations): bf16 MXU inputs + bf16 activations, f32 accumulate.
    prep_bf16 = prepare_params(params, compute_dtype=jnp.bfloat16)
    out = jax.block_until_ready(generator_x_y_forward(x, prep_bf16))
    assert out.shape == (batch, DIM_Y) and out.dtype == jnp.float32
    assert jnp.allclose(out, ref, atol=7e-2, rtol=7e-2), "bf16 path mismatch vs f32 reference"

    # All-f32 path (structure sanity check; also the v5e f32-VPU activation mode).
    prep_f32 = prepare_params(params, compute_dtype=jnp.float32)
    out_f32 = jax.block_until_ready(
        generator_x_y_forward(x, prep_f32, batch_tile=128, bf16_activations=False))
    assert jnp.allclose(out_f32, ref, atol=1e-4, rtol=1e-4), "f32 path mismatch vs reference"

    print("KERNEL_OK")
</pallas_src>

<mosaic_0001>
module attributes {stable_mosaic.version = 11 : i64} {
  func.func @mlp_kernel(%arg0: i32, %arg1: memref<152x32xf32, #tpu.memory_space<vmem>>, %arg2: memref<32x256xbf16, #tpu.memory_space<vmem>>, %arg3: memref<1x256xf32, #tpu.memory_space<vmem>>, %arg4: memref<256x256xbf16, #tpu.memory_space<vmem>>, %arg5: memref<1x256xf32, #tpu.memory_space<vmem>>, %arg6: memref<256x256xbf16, #tpu.memory_space<vmem>>, %arg7: memref<1x256xf32, #tpu.memory_space<vmem>>, %arg8: memref<256x128xbf16, #tpu.memory_space<vmem>>, %arg9: memref<1x128xf32, #tpu.memory_space<vmem>>, %arg10: memref<152x128xbf16, #tpu.memory_space<vmem>>) attributes {dimension_semantics = [#tpu.dimension_semantics<parallel>], iteration_bounds = array<i64: 2>, scalar_prefetch = 0 : i64, scratch_operands = 0 : i64, tpu.core_type = #tpu.core_type<tc>, window_params = [{transform_indices = @transform_0, window_bounds = array<i64: 152, 32>}, {pipeline_mode = #tpu.pipeline_mode<synchronous>, transform_indices = @transform_1, window_bounds = array<i64: 32, 256>}, {pipeline_mode = #tpu.pipeline_mode<synchronous>, transform_indices = @transform_2, window_bounds = array<i64: 1, 256>}, {pipeline_mode = #tpu.pipeline_mode<synchronous>, transform_indices = @transform_3, window_bounds = array<i64: 256, 256>}, {pipeline_mode = #tpu.pipeline_mode<synchronous>, transform_indices = @transform_4, window_bounds = array<i64: 1, 256>}, {pipeline_mode = #tpu.pipeline_mode<synchronous>, transform_indices = @transform_5, window_bounds = array<i64: 256, 256>}, {pipeline_mode = #tpu.pipeline_mode<synchronous>, transform_indices = @transform_6, window_bounds = array<i64: 1, 256>}, {pipeline_mode = #tpu.pipeline_mode<synchronous>, transform_indices = @transform_7, window_bounds = array<i64: 256, 128>}, {pipeline_mode = #tpu.pipeline_mode<synchronous>, transform_indices = @transform_8, window_bounds = array<i64: 1, 128>}, {transform_indices = @transform_9, window_bounds = array<i64: 152, 128>}]} {
    %c0 = arith.constant 0 : index
    %c0_0 = arith.constant 0 : index
    %0 = vector.load %arg1[%c0, %c0_0] : memref<152x32xf32, #tpu.memory_space<vmem>>, vector<152x32xf32>
    %1 = arith.truncf %0 : vector<152x32xf32> to vector<152x32xbf16>
    %c0_1 = arith.constant 0 : index
    %c0_2 = arith.constant 0 : index
    %2 = vector.load %arg2[%c0_1, %c0_2] : memref<32x256xbf16, #tpu.memory_space<vmem>>, vector<32x256xbf16>
    %cst = arith.constant dense<0.000000e+00> : vector<152x256xf32>
    %3 = tpu.matmul %1, %2, %cst {dimension_numbers = #tpu.dot_dimension_numbers<[1], [0], [0], [1], [0, 0, 1, 1], [], []>} : vector<152x32xbf16>, vector<32x256xbf16>, vector<152x256xf32> -> vector<152x256xf32>
    %c0_3 = arith.constant 0 : index
    %c0_4 = arith.constant 0 : index
    %4 = vector.load %arg3[%c0_3, %c0_4] : memref<1x256xf32, #tpu.memory_space<vmem>>, vector<1x256xf32>
    %5 = vector.broadcast %4 : vector<1x256xf32> to vector<152x256xf32>
    %6 = arith.addf %3, %5 : vector<152x256xf32>
    %7 = arith.truncf %6 : vector<152x256xf32> to vector<152x256xbf16>
    %cst_5 = arith.constant 0.000000e+00 : bf16
    %8 = vector.broadcast %cst_5 : bf16 to vector<152x256xbf16>
    %9 = arith.cmpf ogt, %7, %8 : vector<152x256xbf16>
    %cst_6 = arith.constant 1.000980e-02 : bf16
    %10 = vector.broadcast %cst_6 : bf16 to vector<152x256xbf16>
    %11 = arith.mulf %10, %7 : vector<152x256xbf16>
    %12 = arith.select %9, %7, %11 : vector<152x256xi1>, vector<152x256xbf16>
    %c0_7 = arith.constant 0 : index
    %c0_8 = arith.constant 0 : index
    %13 = vector.load %arg4[%c0_7, %c0_8] : memref<256x256xbf16, #tpu.memory_space<vmem>>, vector<256x256xbf16>
    %cst_9 = arith.constant dense<0.000000e+00> : vector<152x256xf32>
    %14 = tpu.matmul %12, %13, %cst_9 {dimension_numbers = #tpu.dot_dimension_numbers<[1], [0], [0], [1], [0, 0, 1, 1], [], []>} : vector<152x256xbf16>, vector<256x256xbf16>, vector<152x256xf32> -> vector<152x256xf32>
    %c0_10 = arith.constant 0 : index
    %c0_11 = arith.constant 0 : index
    %15 = vector.load %arg5[%c0_10, %c0_11] : memref<1x256xf32, #tpu.memory_space<vmem>>, vector<1x256xf32>
    %16 = vector.broadcast %15 : vector<1x256xf32> to vector<152x256xf32>
    %17 = arith.addf %14, %16 : vector<152x256xf32>
    %18 = arith.truncf %17 : vector<152x256xf32> to vector<152x256xbf16>
    %cst_12 = arith.constant 0.000000e+00 : bf16
    %19 = vector.broadcast %cst_12 : bf16 to vector<152x256xbf16>
    %20 = arith.cmpf ogt, %18, %19 : vector<152x256xbf16>
    %cst_13 = arith.constant 1.000980e-02 : bf16
    %21 = vector.broadcast %cst_13 : bf16 to vector<152x256xbf16>
    %22 = arith.mulf %21, %18 : vector<152x256xbf16>
    %23 = arith.select %20, %18, %22 : vector<152x256xi1>, vector<152x256xbf16>
    %c0_14 = arith.constant 0 : index
    %c0_15 = arith.constant 0 : index
    %24 = vector.load %arg6[%c0_14, %c0_15] : memref<256x256xbf16, #tpu.memory_space<vmem>>, vector<256x256xbf16>
    %cst_16 = arith.constant dense<0.000000e+00> : vector<152x256xf32>
    %25 = tpu.matmul %23, %24, %cst_16 {dimension_numbers = #tpu.dot_dimension_numbers<[1], [0], [0], [1], [0, 0, 1, 1], [], []>} : vector<152x256xbf16>, vector<256x256xbf16>, vector<152x256xf32> -> vector<152x256xf32>
    %c0_17 = arith.constant 0 : index
    %c0_18 = arith.constant 0 : index
    %26 = vector.load %arg7[%c0_17, %c0_18] : memref<1x256xf32, #tpu.memory_space<vmem>>, vector<1x256xf32>
    %27 = vector.broadcast %26 : vector<1x256xf32> to vector<152x256xf32>
    %28 = arith.addf %25, %27 : vector<152x256xf32>
    %29 = arith.truncf %28 : vector<152x256xf32> to vector<152x256xbf16>
    %cst_19 = arith.constant 0.000000e+00 : bf16
    %30 = vector.broadcast %cst_19 : bf16 to vector<152x256xbf16>
    %31 = arith.cmpf ogt, %29, %30 : vector<152x256xbf16>
    %cst_20 = arith.constant 1.000980e-02 : bf16
    %32 = vector.broadcast %cst_20 : bf16 to vector<152x256xbf16>
    %33 = arith.mulf %32, %29 : vector<152x256xbf16>
    %34 = arith.select %31, %29, %33 : vector<152x256xi1>, vector<152x256xbf16>
    %c0_21 = arith.constant 0 : index
    %c0_22 = arith.constant 0 : index
    %35 = vector.load %arg8[%c0_21, %c0_22] : memref<256x128xbf16, #tpu.memory_space<vmem>>, vector<256x128xbf16>
    %cst_23 = arith.constant dense<0.000000e+00> : vector<152x128xf32>
    %36 = tpu.matmul %34, %35, %cst_23 {dimension_numbers = #tpu.dot_dimension_numbers<[1], [0], [0], [1], [0, 0, 1, 1], [], []>} : vector<152x256xbf16>, vector<256x128xbf16>, vector<152x128xf32> -> vector<152x128xf32>
    %c0_24 = arith.constant 0 : index
    %c0_25 = arith.constant 0 : index
    %37 = vector.load %arg9[%c0_24, %c0_25] : memref<1x128xf32, #tpu.memory_space<vmem>>, vector<1x128xf32>
    %38 = vector.broadcast %37 : vector<1x128xf32> to vector<152x128xf32>
    %39 = arith.addf %36, %38 : vector<152x128xf32>
    %40 = arith.truncf %39 : vector<152x128xf32> to vector<152x128xbf16>
    %c0_26 = arith.constant 0 : index
    %c0_27 = arith.constant 0 : index
    %41 = vector.load %arg10[%c0_26, %c0_27] : memref<152x128xbf16, #tpu.memory_space<vmem>>, vector<152x128xbf16>
    tpu.vector_store %arg10[%c0_26, %c0_27], %40 {strides = array<i32>} : memref<152x128xbf16, #tpu.memory_space<vmem>>, vector<152x128xbf16>,
    return
  }
  func.func @transform_0(%arg0: i32) -> (i32, i32) {
    %c0_i32 = arith.constant 0 : i32
    %c0_i32_0 = arith.constant 0 : i32
    return %arg0, %c0_i32 : i32, i32
  }
  func.func @transform_1(%arg0: i32) -> (i32, i32) {
    %c0_i32 = arith.constant 0 : i32
    %c0_i32_0 = arith.constant 0 : i32
    %c0_i32_1 = arith.constant 0 : i32
    return %c0_i32, %c0_i32_0 : i32, i32
  }
  func.func @transform_2(%arg0: i32) -> (i32, i32) {
    %c0_i32 = arith.constant 0 : i32
    %c0_i32_0 = arith.constant 0 : i32
    %c0_i32_1 = arith.constant 0 : i32
    return %c0_i32, %c0_i32_0 : i32, i32
  }
  func.func @transform_3(%arg0: i32) -> (i32, i32) {
    %c0_i32 = arith.constant 0 : i32
    %c0_i32_0 = arith.constant 0 : i32
    %c0_i32_1 = arith.constant 0 : i32
    return %c0_i32, %c0_i32_0 : i32, i32
  }
  func.func @transform_4(%arg0: i32) -> (i32, i32) {
    %c0_i32 = arith.constant 0 : i32
    %c0_i32_0 = arith.constant 0 : i32
    %c0_i32_1 = arith.constant 0 : i32
    return %c0_i32, %c0_i32_0 : i32, i32
  }
  func.func @transform_5(%arg0: i32) -> (i32, i32) {
    %c0_i32 = arith.constant 0 : i32
    %c0_i32_0 = arith.constant 0 : i32
    %c0_i32_1 = arith.constant 0 : i32
    return %c0_i32, %c0_i32_0 : i32, i32
  }
  func.func @transform_6(%arg0: i32) -> (i32, i32) {
    %c0_i32 = arith.constant 0 : i32
    %c0_i32_0 = arith.constant 0 : i32
    %c0_i32_1 = arith.constant 0 : i32
    return %c0_i32, %c0_i32_0 : i32, i32
  }
  func.func @transform_7(%arg0: i32) -> (i32, i32) {
    %c0_i32 = arith.constant 0 : i32
    %c0_i32_0 = arith.constant 0 : i32
    %c0_i32_1 = arith.constant 0 : i32
    return %c0_i32, %c0_i32_0 : i32, i32
  }
  func.func @transform_8(%arg0: i32) -> (i32, i32) {
    %c0_i32 = arith.constant 0 : i32
    %c0_i32_0 = arith.constant 0 : i32
    %c0_i32_1 = arith.constant 0 : i32
    return %c0_i32, %c0_i32_0 : i32, i32
  }
  func.func @transform_9(%arg0: i32) -> (i32, i32) {
    %c0_i32 = arith.constant 0 : i32
    %c0_i32_0 = arith.constant 0 : i32
    return %arg0, %c0_i32 : i32, i32
  }
}

</mosaic_0001>

<bundles_post_ra>
// kernel: generator_x_y_forward.1
= control target key start
LH: loop header
LB: loop body
LE: loop exit
PB: predicated region body
PF: predicated region fallthrough
CT: control target
= control target key end

     0   :  { %s2347_s30 = smov 0   ;;  %s2858_s0 = inlined_call_operand.vmem [shape: f32[304,32], index: 0, kind: input, shape index: {}]   ;;  %s2859_s1 = inlined_call_operand.vmem [shape: bf16[32,256], index: 1, kind: input, shape index: {}]   ;;  %s2860_s2 = inlined_call_operand.vmem [shape: f32[1,256], index: 2, kind: input, shape index: {}]   ;;  %s2861_s3 = inlined_call_operand.vmem [shape: bf16[256,256], index: 3, kind: input, shape index: {}]   ;;  %s2862_s4 = inlined_call_operand.vmem [shape: f32[1,256], index: 4, kind: input, shape index: {}]   ;;  %s2863_s5 = inlined_call_operand.vmem [shape: bf16[256,256], index: 5, kind: input, shape index: {}]   ;;  %s2864_s6 = inlined_call_operand.vmem [shape: f32[1,256], index: 6, kind: input, shape index: {}]   ;;  %s2865_s7 = inlined_call_operand.vmem [shape: bf16[256,128], index: 7, kind: input, shape index: {}]   ;;  %s2866_s8 = inlined_call_operand.vmem [shape: f32[1,128], index: 8, kind: input, shape index: {}]   ;;  %s2867_s9 = inlined_call_operand.vmem [shape: bf16[304,128], index: 9, kind: output, shape index: {}]  }
   0x1 LB: > { %s1874_s10 = sadd.s32 4294967295, %s2294_s30   ;;  %p1878_p0 = scmp.ge.s32.totalorder %s2294_s30, 1  ;;  %s2294_s30 = sphi %s2347_s30, %s19_s30  }
   0x2   : > { %p288_p1 = scmp.lt.s32.totalorder %s2294_s30, 3 }
   0x4   : > { %p289_p2 = pnand %p1878_p0, %p288_p1 }
   0x5   : > { %v2170_v0 = vld [vmem:[%s2859_s1 + $0x4] ss:$8 sps:$4 sm:$0xff] (!%p289_p2)   ;;  %s324_s13 = smul.u32 (!%p289_p2), 19, %s1874_s10  ;;  %v2172_v1 = vld [vmem:[%s2859_s1] ss:$8 sps:$4 sm:$0xff] (!%p289_p2)   ;;  %v2296_v2 = vmov (!%p289_p2), 0  }
   0x6   : > { %292 = sbr.rel (%p289_p2) target bundleno = 980 (0x3d4), region = 56  ;;  %466 = vmatprep.mubr.bf16.mxu0 (!%p289_p2), %v2296_v2  ;;  %434 = vmatprep.subr.bf16.mxu0 (!%p289_p2), %v2170_v0  ;;  %v2173_v3 = vld [vmem:[%s2859_s1 + $0x14] ss:$8 sps:$4 sm:$0xff] (!%p289_p2)   ;;  %v2175_v4 = vld [vmem:[%s2859_s1 + $0x10] ss:$8 sps:$4 sm:$0xff] (!%p289_p2)   ;;  %vm403_vm0 = vcmask (!%p289_p2), 261120  }
   0x7   : > { %p325_p3 = scmp.lt.s32.totalorder (!%p289_p2), %s324_s13, 37  ;;  %435 = vmatpush1.bf16.msra.mxu0 (!%p289_p2), %v2172_v1  ;;  %v2176_v5 = vld [vmem:[%s2861_s3 + $0x4] ss:$8 sps:$4 sm:$0xff] (!%p289_p2)   ;;  %v2178_v6 = vld [vmem:[%s2861_s3] ss:$8 sps:$4 sm:$0xff] (!%p289_p2)  }
   0x8   : > { %436 = vmatprep.subr.bf16.mxu0 (!%p289_p2), %v2173_v3  ;;  %v2179_v7 = vld [vmem:[%s2861_s3 + $0x14] ss:$8 sps:$4 sm:$0xff] (!%p289_p2)   ;;  %849 = vmatprep.subr.bf16.mxu1 (!%p289_p2), %v2176_v5  ;;  %v2181_v8 = vld [vmem:[%s2861_s3 + $0x10] ss:$8 sps:$4 sm:$0xff] (!%p289_p2)   ;;  %v2182_v9 = vld [vmem:[%s2861_s3 + $0x24] ss:$8 sps:$4 sm:$0xff] (!%p289_p2)  }
   0x9   : > { %850 = vmatpush1.bf16.msra.mxu1 (!%p289_p2), %v2178_v6  ;;  %v2184_v13 = vld [vmem:[%s2861_s3 + $0x20] ss:$8 sps:$4 sm:$0xff] (!%p289_p2)   ;;  %v2185_v14 = vld [vmem:[%s2861_s3 + $0x34] ss:$8 sps:$4 sm:$0xff] (!%p289_p2)   ;;  %v2187_v17 = vld [vmem:[%s2861_s3 + $0x30] ss:$8 sps:$4 sm:$0xff] (!%p289_p2)  }
   0xa   : > { %851 = vmatprep.subr.bf16.mxu1 (!%p289_p2), %v2179_v7  ;;  %v2188_v19 = vld [vmem:[%s2861_s3 + $0x44] ss:$8 sps:$4 sm:$0xff] (!%p289_p2)   ;;  %v2190_v20 = vld [vmem:[%s2861_s3 + $0x40] ss:$8 sps:$4 sm:$0xff] (!%p289_p2)   ;;  %v2191_v21 = vld [vmem:[%s2861_s3 + $0x54] ss:$8 sps:$4 sm:$0xff] (!%p289_p2)  }
   0xb   : > { %437 = vmatpush1.bf16.msra.mxu0 (!%p289_p2), %v2175_v4  ;;  %v2193_v24 = vld [vmem:[%s2861_s3 + $0x50] ss:$8 sps:$4 sm:$0xff] (!%p289_p2)   ;;  %v2194_v26 = vld [vmem:[%s2861_s3 + $0x64] ss:$8 sps:$4 sm:$0xff] (!%p289_p2)   ;;  %v2196_v29 = vld [vmem:[%s2861_s3 + $0x60] ss:$8 sps:$4 sm:$0xff] (!%p289_p2)  }
   0xc   : > { %v2197_v30 = vld [vmem:[%s2861_s3 + $0x74] ss:$8 sps:$4 sm:$0xff] (!%p289_p2)   ;;  %v2199_v31 = vld [vmem:[%s2861_s3 + $0x70] ss:$8 sps:$4 sm:$0xff] (!%p289_p2)   ;;  %v2200_v32 = vld [vmem:[%s2861_s3 + $0x84] ss:$8 sps:$4 sm:$0xff] (!%p289_p2)  }
   0xd   : > { %s2869_s13 = smov (!%p325_p3, %s324_s13), 37  ;;  %852 = vmatpush1.bf16.msra.mxu1 %v2181_v8  ;;  %v2202_v34 = vld [vmem:[%s2861_s3 + $0x80] ss:$8 sps:$4 sm:$0xff]   ;;  %v2203_v35 = vld [vmem:[%s2861_s3 + $0x94] ss:$8 sps:$4 sm:$0xff]  }
   0xe   : > { %s1879_s26 = sshll.u32 %s2869_s13, 3  ;;  %853 = vmatprep.subr.bf16.mxu1 %v2182_v9  ;;  %v2205_v38 = vld [vmem:[%s2861_s3 + $0x90] ss:$8 sps:$4 sm:$0xff]   ;;  %v2206_v39 = vld [vmem:[%s2861_s3 + $0xa4] ss:$8 sps:$4 sm:$0xff]   ;;  %s1880_s23 = sshll.u32 %s2869_s13, 2 }
   0xf   : > { %s2386_s11 = scalar_lea.vmem %s2858_s0, %s1879_s26  ;;  %v2208_v41 = vld [vmem:[%s2861_s3 + $0xa0] ss:$8 sps:$4 sm:$0xff]   ;;  %v2209_v42 = vld [vmem:[%s2861_s3 + $0xb4] ss:$8 sps:$4 sm:$0xff]   ;;  %v2211_v45 = vld [vmem:[%s2861_s3 + $0xb0] ss:$8 sps:$4 sm:$0xff]   ;;  %s2826_s26 = scalar_lea.vmem %s2867_s9, %s1880_s23 }
  0x10   : > { %v338_v10 = vld [vmem:[%s2386_s11] sm:$0xff]  ;;  %v339_v11 = vld [vmem:[%s2386_s11 + $0x8] sm:$0xff]  ;;  %v340_v15 = vld [vmem:[%s2386_s11 + $0x10] sm:$0xff] }
  0x11   : > { %v357_v12 = vpack.c.bf16 %v339_v11, %v338_v10  ;;  %v341_v16 = vld [vmem:[%s2386_s11 + $0x18] sm:$0xff]  ;;  %854 = vmatpush1.bf16.msra.mxu1 %v2184_v13  ;;  %v342_v22 = vld [vmem:[%s2386_s11 + $0x20] sm:$0xff]  ;;  %v343_v23 = vld [vmem:[%s2386_s11 + $0x28] sm:$0xff] }
  0x12   : > { %v358_v18 = vpack.c.bf16 %v341_v16, %v340_v15  ;;  %855 = vmatprep.subr.bf16.mxu1 %v2185_v14  ;;  %v359_v25 = vpack.c.bf16 %v343_v23, %v342_v22  ;;  %v344_v27 = vld [vmem:[%s2386_s11 + $0x30] sm:$0xff]  ;;  %v345_v28 = vld [vmem:[%s2386_s11 + $0x38] sm:$0xff]  ;;  %v346_v36 = vld [vmem:[%s2386_s11 + $0x40] sm:$0xff] }
  0x13   : > { %1885 = vmatmul.mubr.msk.bf16.vlgmr.msra.gmra.mrb[0].mxu0 %vm403_vm0, %v357_v12  ;;  %v360_v33 = vpack.c.bf16 %v345_v28, %v344_v27  ;;  %v347_v37 = vld [vmem:[%s2386_s11 + $0x48] sm:$0xff]  ;;  %v348_v43 = vld [vmem:[%s2386_s11 + $0x50] sm:$0xff]  ;;  %v349_v44 = vld [vmem:[%s2386_s11 + $0x58] sm:$0xff] }
  0x14   : > { %476 = vmatprep.mubr.bf16.mxu0 %v2296_v2  ;;  %v361_v40 = vpack.c.bf16 %v347_v37, %v346_v36  ;;  %v2212_v46 = vld [vmem:[%s2861_s3 + $0xc4] ss:$8 sps:$4 sm:$0xff]   ;;  %v362_v47 = vpack.c.bf16 %v349_v44, %v348_v43  ;;  %v2214_v48 = vld [vmem:[%s2861_s3 + $0xc0] ss:$8 sps:$4 sm:$0xff]   ;;  %v352_v52 = vld [vmem:[%s2386_s11 + $0x70] sm:$0xff] }
  0x15   : > { %856 = vmatpush1.bf16.msra.mxu1 %v2187_v17  ;;  %v350_v49 = vld [vmem:[%s2386_s11 + $0x60] sm:$0xff]  ;;  %v351_v50 = vld [vmem:[%s2386_s11 + $0x68] sm:$0xff]  ;;  %v353_v53 = vld [vmem:[%s2386_s11 + $0x78] sm:$0xff] }
  0x16   : > { %857 = vmatprep.subr.bf16.mxu1 %v2188_v19  ;;  %v363_v51 = vpack.c.bf16 %v351_v50, %v350_v49  ;;  %v364_v54 = vpack.c.bf16 %v353_v53, %v352_v52  ;;  %v354_v55 = vld [vmem:[%s2386_s11 + $0x80] sm:$0xff]  ;;  %v355_v56 = vld [vmem:[%s2386_s11 + $0x88] sm:$0xff]  ;;  %v356_v58 = vld [vmem:[%s2386_s11 + $0x90] sm:$0xff]  ;;  %v373_v19 = vlaneseq }
  0x17   : > { %v365_v57 = vpack.c.bf16 %v355_v56, %v354_v55  ;;  %v366_v59 = vpack.c.bf16 %v356_v58, %v356_v58  ;;  %v2215_v60 = vld [vmem:[%s2861_s3 + $0xd4] ss:$8 sps:$4 sm:$0xff]   ;;  %v2217_v61 = vld [vmem:[%s2861_s3 + $0xd0] ss:$8 sps:$4 sm:$0xff]   ;;  %v2218_v62 = vld [vmem:[%s2861_s3 + $0xe4] ss:$8 sps:$4 sm:$0xff]  }
  0x18   : > { %v2220_v63 = vld [vmem:[%s2861_s3 + $0xe0] ss:$8 sps:$4 sm:$0xff]   ;;  %v2221_v0 = vld [vmem:[%s2861_s3 + $0xf4] ss:$8 sps:$4 sm:$0xff]   ;;  %v2223_v1 = vld [vmem:[%s2861_s3 + $0xf0] ss:$8 sps:$4 sm:$0xff]  }
  0x19   : > { %858 = vmatpush1.bf16.msra.mxu1 %v2190_v20  ;;  %v2226_v3 = vld [vmem:[%s2863_s5 + $0x4] ss:$8 sps:$4 sm:$0xff]   ;;  %v2229_v4 = vld [vmem:[%s2863_s5 + $0x14] ss:$8 sps:$4 sm:$0xff]   ;;  %v2227_v5 = vld [vmem:[%s2863_s5 + $0x10] ss:$8 sps:$4 sm:$0xff]  }
  0x1a   : > { %859 = vmatprep.subr.bf16.mxu1 %v2191_v21  ;;  %1264 = vmatprep.subr.bf16.mxu0 %v2226_v3  ;;  %v2232_v6 = vld [vmem:[%s2863_s5 + $0x24] ss:$8 sps:$4 sm:$0xff]   ;;  %v2230_v7 = vld [vmem:[%s2863_s5 + $0x20] ss:$8 sps:$4 sm:$0xff]   ;;  %v2235_v8 = vld [vmem:[%s2863_s5 + $0x34] ss:$8 sps:$4 sm:$0xff]  }
  0x1b   : > { %1886 = vmatmul.mubr.msk.bf16.gmra.mrb[4].mxu0 %vm403_vm0, %v358_v18  ;;  %v2233_v9 = vld [vmem:[%s2863_s5 + $0x30] ss:$8 sps:$4 sm:$0xff]   ;;  %v2238_v10 = vld [vmem:[%s2863_s5 + $0x44] ss:$8 sps:$4 sm:$0xff]   ;;  %v2236_v11 = vld [vmem:[%s2863_s5 + $0x40] ss:$8 sps:$4 sm:$0xff]  }
  0x1c   : > { %486 = vmatprep.mubr.bf16.mxu0 %v2296_v2  ;;  %v2241_v12 = vld [vmem:[%s2863_s5 + $0x54] ss:$8 sps:$4 sm:$0xff]   ;;  %v2239_v13 = vld [vmem:[%s2863_s5 + $0x50] ss:$8 sps:$4 sm:$0xff]   ;;  %v2244_v14 = vld [vmem:[%s2863_s5 + $0x64] ss:$8 sps:$4 sm:$0xff]  }
  0x1d   : > { %860 = vmatpush1.bf16.msra.mxu1 %v2193_v24  ;;  %v2242_v15 = vld [vmem:[%s2863_s5 + $0x60] ss:$8 sps:$4 sm:$0xff]   ;;  %v2247_v16 = vld [vmem:[%s2863_s5 + $0x74] ss:$8 sps:$4 sm:$0xff]   ;;  %v2245_v17 = vld [vmem:[%s2863_s5 + $0x70] ss:$8 sps:$4 sm:$0xff]  }
  0x1e   : > { %861 = vmatprep.subr.bf16.mxu1 %v2194_v26  ;;  %v2250_v18 = vld [vmem:[%s2863_s5 + $0x84] ss:$8 sps:$4 sm:$0xff]   ;;  %v2248_v20 = vld [vmem:[%s2863_s5 + $0x80] ss:$8 sps:$4 sm:$0xff]   ;;  %v2253_v21 = vld [vmem:[%s2863_s5 + $0x94] ss:$8 sps:$4 sm:$0xff]  }
  0x1f   : > { %v374_v22 = vshrl.u32 %v373_v19, 7  ;;  %v2251_v23 = vld [vmem:[%s2863_s5 + $0x90] ss:$8 sps:$4 sm:$0xff]   ;;  %v2256_v24 = vld [vmem:[%s2863_s5 + $0xa4] ss:$8 sps:$4 sm:$0xff]  }
  0x20   : > { %v2254_v26 = vld [vmem:[%s2863_s5 + $0xa0] ss:$8 sps:$4 sm:$0xff]   ;;  %v2265_v43 = vld [vmem:[%s2863_s5 + $0xd4] ss:$8 sps:$4 sm:$0xff]  }
  0x21   : > { %862 = vmatpush1.bf16.msra.mxu1 %v2196_v29  ;;  %v371_v27 = vld [vmem:[%s2860_s2] sm:$0x3]  ;;  %v2581_v28 = vsub.s32 1, %v374_v22  ;;  %v2259_v29 = vld [vmem:[%s2863_s5 + $0xb4] ss:$8 sps:$4 sm:$0xff]  }
  0x22   : > { %863 = vmatprep.subr.bf16.mxu1 %v2197_v30 }
  0x23   : > { %1887 = vmatmul.mubr.msk.bf16.gmra.mrb[8].mxu0 %vm403_vm0, %v359_v25  ;;  %v2573_v25 = vsub.s32 0, %v374_v22 }
  0x24   : > { %496 = vmatprep.mubr.bf16.mxu0 %v2296_v2 }
  0x25   : > { %864 = vmatpush1.bf16.msra.mxu1 %v2199_v31  ;;  %v2587_v30 = vrot.slane %v371_v27, %v2573_v25  ;;  %v2257_v31 = vld [vmem:[%s2863_s5 + $0xb0] ss:$8 sps:$4 sm:$0xff]  }
  0x26   : > { %865 = vmatprep.subr.bf16.mxu1 %v2200_v32 }
  0x29   : > { %866 = vmatpush1.bf16.msra.mxu1 %v2202_v34  ;;  %v2262_v34 = vld [vmem:[%s2863_s5 + $0xc4] ss:$8 sps:$4 sm:$0xff]  }
  0x2a   : > { %867 = vmatprep.subr.bf16.mxu1 %v2203_v35 }
  0x2b   : > { %1888 = vmatmul.mubr.msk.bf16.gmra.mrb[12].mxu0 %vm403_vm0, %v360_v33  ;;  %v2593_v33 = vrot.slane %v371_v27, %v2581_v28 }
  0x2c   : > { %506 = vmatprep.mubr.bf16.mxu0 %v2296_v2 }
  0x2d   : > { %868 = vmatpush1.bf16.msra.mxu1 %v2205_v38 }
  0x2e   : > { %869 = vmatprep.subr.bf16.mxu1 %v2206_v39 }
  0x31   : > { %870 = vmatpush1.bf16.msra.mxu1 %v2208_v41 }
  0x32   : > { %871 = vmatprep.subr.bf16.mxu1 %v2209_v42 }
  0x33   : > { %1889 = vmatmul.mubr.msk.bf16.gmra.mrb[16].mxu0 %vm403_vm0, %v361_v40  ;;  %v2260_v40 = vld [vmem:[%s2863_s5 + $0xc0] ss:$8 sps:$4 sm:$0xff]  }
  0x34   : > { %516 = vmatprep.mubr.bf16.mxu0 %v2296_v2 }
  0x35   : > { %872 = vmatpush1.bf16.msra.mxu1 %v2211_v45 }
  0x36   : > { %873 = vmatprep.subr.bf16.mxu1 %v2212_v46 }
  0x39   : > { %874 = vmatpush1.bf16.msra.mxu1 %v2214_v48 }
  0x3a   : > { %875 = vmatprep.subr.bf16.mxu1 %v2215_v60 }
  0x3b   : > { %1890 = vmatmul.mubr.msk.bf16.gmra.mrb[20].mxu0 %vm403_vm0, %v362_v47  ;;  %v2263_v47 = vld [vmem:[%s2863_s5 + $0xd0] ss:$8 sps:$4 sm:$0xff]  }
  0x3c   : > { %526 = vmatprep.mubr.bf16.mxu0 %v2296_v2 }
  0x3d   : > { %876 = vmatpush1.bf16.msra.mxu1 %v2217_v61 }
  0x3e   : > { %877 = vmatprep.subr.bf16.mxu1 %v2218_v62 }
  0x41   : > { %878 = vmatpush1.bf16.msra.mxu1 %v2220_v63 }
  0x42   : > { %879 = vmatprep.subr.bf16.mxu1 %v2221_v0 }
  0x43   : > { %1891 = vmatmul.mubr.msk.bf16.gmra.mrb[24].mxu0 %vm403_vm0, %v363_v51 }
  0x44   : > { %536 = vmatprep.mubr.bf16.mxu0 %v2296_v2 }
  0x45   : > { %880 = vmatpush1.bf16.msra.mxu1 %v2223_v1 }
  0x4b   : > { %1892 = vmatmul.mubr.msk.bf16.gmra.mrb[28].mxu0 %vm403_vm0, %v364_v54 }
  0x4c   : > { %546 = vmatprep.mubr.bf16.mxu0 %v2296_v2 }
  0x53   : > { %1893 = vmatmul.mubr.msk.bf16.gmra.mrb[32].mxu0 %vm403_vm0, %v365_v57 }
  0x54   : > { %556 = vmatprep.mubr.bf16.mxu0 %v2296_v2  ;;  %v2224_v2 = vld [vmem:[%s2863_s5] ss:$8 sps:$4 sm:$0xff]  }
  0x55   : > { %1265 = vmatpush1.bf16.msra.mxu0 %v2224_v2 }
  0x56   : > { %1266 = vmatprep.subr.bf16.mxu0 %v2229_v4 }
  0x59   : > { %1267 = vmatpush1.bf16.msra.mxu0 %v2227_v5 }
  0x5a   : > { %1268 = vmatprep.subr.bf16.mxu0 %v2232_v6 }
  0x5b   : > { %1894 = vmatmul.mubr.msk.bf16.gmra.mrb[36].mxu0 %vm403_vm0, %v366_v59 }
  0x5d   : > { %1269 = vmatpush1.bf16.msra.mxu0 %v2230_v7 }
  0x5e   : > { %1270 = vmatprep.subr.bf16.mxu0 %v2235_v8 }
  0x61   : > { %1271 = vmatpush1.bf16.msra.mxu0 %v2233_v9 }
  0x62   : > { %1272 = vmatprep.subr.bf16.mxu0 %v2238_v10 }
  0x65   : > { %1273 = vmatpush1.bf16.msra.mxu0 %v2236_v11 }
  0x66   : > { %1274 = vmatprep.subr.bf16.mxu0 %v2241_v12 }
  0x69   : > { %1275 = vmatpush1.bf16.msra.mxu0 %v2239_v13 }
  0x6a   : > { %1276 = vmatprep.subr.bf16.mxu0 %v2244_v14 }
  0x6d   : > { %1277 = vmatpush1.bf16.msra.mxu0 %v2242_v15 }
  0x6e   : > { %1278 = vmatprep.subr.bf16.mxu0 %v2247_v16 }
  0x71   : > { %1279 = vmatpush1.bf16.msra.mxu0 %v2245_v17 }
  0x72   : > { %1280 = vmatprep.subr.bf16.mxu0 %v2250_v18 }
  0x75   : > { %1281 = vmatpush1.bf16.msra.mxu0 %v2248_v20 }
  0x76   : > { %1282 = vmatprep.subr.bf16.mxu0 %v2253_v21 }
  0x79   : > { %1283 = vmatpush1.bf16.msra.mxu0 %v2251_v23 }
  0x7a   : > { %1284 = vmatprep.subr.bf16.mxu0 %v2256_v24 }
  0x7d   : > { %1285 = vmatpush1.bf16.msra.mxu0 %v2254_v26 }
  0x7e   : > { %1286 = vmatprep.subr.bf16.mxu0 %v2259_v29 }
  0x81   : > { %1287 = vmatpush1.bf16.msra.mxu0 %v2257_v31 }
  0x82   : > { %1288 = vmatprep.subr.bf16.mxu0 %v2262_v34 }
  0x85   : > { %1289 = vmatpush1.bf16.msra.mxu0 %v2260_v40 }
  0x86   : > { %1290 = vmatprep.subr.bf16.mxu0 %v2265_v43 }
  0x89   : > { %1291 = vmatpush1.bf16.msra.mxu0 %v2263_v47 }
  0xe6   : > { %v468_v32 = vpop.f32.mrb[0].mxu0 }
  0xe7   : > { %v470_v35 = vpop.f32.mrb[1].mxu0  ;;  %v469_v37 = vadd.f32 %v468_v32, %v2587_v30 }
  0xe8   : > { %v472_v36 = vpop.f32.mrb[2].mxu0  ;;  %v471_v41 = vadd.f32 %v470_v35, %v2593_v33 }
  0xe9   : > { %v473_v38 = vadd.f32 %v472_v36, %v2587_v30  ;;  %v474_v39 = vpop.f32.mrb[3].mxu0 }
  0xea   : > { %v475_v42 = vadd.f32 %v474_v39, %v2593_v33 }
  0xeb   : > { %v565_v44 = vpack.c.bf16 %v473_v38, %v469_v37 }
  0xec   : > { %v566_v45 = vpack.c.bf16 %v475_v42, %v471_v41 }
  0xed   : > { %v605_v46 = vmul.bf16 1009007652, %v565_v44  ;;  %vm585_vm2 = vcmp.gt.bf16.partialorder %v565_v44, 0 }
  0xee   : > { %v478_v48 = vpop.f32.mrb[4].mxu0  ;;  %vm586_vm1 = vcmp.gt.bf16.partialorder %v566_v45, 0  ;;  %v606_v49 = vmul.bf16 1009007652, %v566_v45 }
  0xef   : > { %v480_v50 = vpop.f32.mrb[5].mxu0  ;;  %v479_v53 = vadd.f32 %v478_v48, %v2587_v30  ;;  %v625_v56 = vsel %vm585_vm2, %v565_v44, %v605_v46 }
  0xf0   : > { %v482_v51 = vpop.f32.mrb[6].mxu0  ;;  %v626_v52 = vsel %vm586_vm1, %v566_v45, %v606_v49  ;;  %v481_v57 = vadd.f32 %v480_v50, %v2593_v33 }
  0xf1   : > { %v483_v54 = vadd.f32 %v482_v51, %v2587_v30  ;;  %v484_v55 = vpop.f32.mrb[7].mxu0  ;;  %881 = vmatprep.mubr.bf16.mxu1 %v626_v52 }
  0xf2   : > { %v485_v58 = vadd.f32 %v484_v55, %v2593_v33  ;;  %882 = vmatmul.mubr.bf16.vlgmr.msra.gmra.mrb[0].mxu1 %v625_v56 }
  0xf3   : > { %v567_v59 = vpack.c.bf16 %v483_v54, %v479_v53 }
  0xf4   : > { %v568_v60 = vpack.c.bf16 %v485_v58, %v481_v57 }
  0xf5   : > { %v607_v61 = vmul.bf16 1009007652, %v567_v59  ;;  %vm587_vm4 = vcmp.gt.bf16.partialorder %v567_v59, 0 }
  0xf6   : > { %v488_v62 = vpop.f32.mrb[8].mxu0  ;;  %vm588_vm3 = vcmp.gt.bf16.partialorder %v568_v60, 0  ;;  %v608_v63 = vmul.bf16 1009007652, %v568_v60 }
  0xf7   : > { %v490_v0 = vpop.f32.mrb[9].mxu0  ;;  %v489_v3 = vadd.f32 %v488_v62, %v2587_v30  ;;  %v627_v6 = vsel %vm587_vm4, %v567_v59, %v607_v61 }
  0xf8   : > { %v492_v1 = vpop.f32.mrb[10].mxu0  ;;  %v628_v2 = vsel %vm588_vm3, %v568_v60, %v608_v63  ;;  %v491_v7 = vadd.f32 %v490_v0, %v2593_v33 }
  0xf9   : > { %v493_v4 = vadd.f32 %v492_v1, %v2587_v30  ;;  %v494_v5 = vpop.f32.mrb[11].mxu0  ;;  %891 = vmatprep.mubr.bf16.mxu1 %v628_v2 }
  0xfa   : > { %v495_v8 = vadd.f32 %v494_v5, %v2593_v33  ;;  %892 = vmatmul.mubr.bf16.gmra.mrb[4].mxu1 %v627_v6 }
  0xfb   : > { %v569_v9 = vpack.c.bf16 %v493_v4, %v489_v3 }
  0xfc   : > { %v570_v10 = vpack.c.bf16 %v495_v8, %v491_v7 }
  0xfd   : > { %v609_v11 = vmul.bf16 1009007652, %v569_v9  ;;  %vm589_vm6 = vcmp.gt.bf16.partialorder %v569_v9, 0 }
  0xfe   : > { %v498_v12 = vpop.f32.mrb[12].mxu0  ;;  %vm590_vm5 = vcmp.gt.bf16.partialorder %v570_v10, 0  ;;  %v610_v13 = vmul.bf16 1009007652, %v570_v10 }
  0xff   : > { %v500_v14 = vpop.f32.mrb[13].mxu0  ;;  %v499_v17 = vadd.f32 %v498_v12, %v2587_v30  ;;  %v629_v20 = vsel %vm589_vm6, %v569_v9, %v609_v11 }
 0x100   : > { %v502_v15 = vpop.f32.mrb[14].mxu0  ;;  %v630_v16 = vsel %vm590_vm5, %v570_v10, %v610_v13  ;;  %v501_v21 = vadd.f32 %v500_v14, %v2593_v33 }
 0x101   : > { %v503_v18 = vadd.f32 %v502_v15, %v2587_v30  ;;  %v504_v19 = vpop.f32.mrb[15].mxu0  ;;  %901 = vmatprep.mubr.bf16.mxu1 %v630_v16 }
 0x102   : > { %v505_v22 = vadd.f32 %v504_v19, %v2593_v33  ;;  %902 = vmatmul.mubr.bf16.gmra.mrb[8].mxu1 %v629_v20 }
 0x103   : > { %v571_v23 = vpack.c.bf16 %v503_v18, %v499_v17 }
 0x104   : > { %v572_v24 = vpack.c.bf16 %v505_v22, %v501_v21 }
 0x105   : > { %v611_v26 = vmul.bf16 1009007652, %v571_v23  ;;  %vm591_vm8 = vcmp.gt.bf16.partialorder %v571_v23, 0 }
 0x106   : > { %v508_v27 = vpop.f32.mrb[16].mxu0  ;;  %vm592_vm7 = vcmp.gt.bf16.partialorder %v572_v24, 0  ;;  %v612_v29 = vmul.bf16 1009007652, %v572_v24 }
 0x107   : > { %v510_v31 = vpop.f32.mrb[17].mxu0  ;;  %v509_v35 = vadd.f32 %v508_v27, %v2587_v30  ;;  %v631_v38 = vsel %vm591_vm8, %v571_v23, %v611_v26 }
 0x108   : > { %v512_v32 = vpop.f32.mrb[18].mxu0  ;;  %v632_v34 = vsel %vm592_vm7, %v572_v24, %v612_v29  ;;  %v511_v39 = vadd.f32 %v510_v31, %v2593_v33 }
 0x109   : > { %v513_v36 = vadd.f32 %v512_v32, %v2587_v30  ;;  %v514_v37 = vpop.f32.mrb[19].mxu0  ;;  %911 = vmatprep.mubr.bf16.mxu1 %v632_v34 }
 0x10a   : > { %v515_v40 = vadd.f32 %v514_v37, %v2593_v33  ;;  %912 = vmatmul.mubr.bf16.gmra.mrb[12].mxu1 %v631_v38 }
 0x10b   : > { %v573_v41 = vpack.c.bf16 %v513_v36, %v509_v35 }
 0x10c   : > { %v574_v42 = vpack.c.bf16 %v515_v40, %v511_v39 }
 0x10d   : > { %v613_v43 = vmul.bf16 1009007652, %v573_v41  ;;  %vm593_vm10 = vcmp.gt.bf16.partialorder %v573_v41, 0 }
 0x10e   : > { %v518_v44 = vpop.f32.mrb[20].mxu0  ;;  %vm594_vm9 = vcmp.gt.bf16.partialorder %v574_v42, 0  ;;  %v614_v45 = vmul.bf16 1009007652, %v574_v42 }
 0x10f   : > { %v520_v46 = vpop.f32.mrb[21].mxu0  ;;  %v519_v49 = vadd.f32 %v518_v44, %v2587_v30  ;;  %v633_v52 = vsel %vm593_vm10, %v573_v41, %v613_v43 }
 0x110   : > { %v522_v47 = vpop.f32.mrb[22].mxu0  ;;  %v634_v48 = vsel %vm594_vm9, %v574_v42, %v614_v45  ;;  %v521_v53 = vadd.f32 %v520_v46, %v2593_v33 }
 0x111   : > { %v523_v50 = vadd.f32 %v522_v47, %v2587_v30  ;;  %v524_v51 = vpop.f32.mrb[23].mxu0  ;;  %921 = vmatprep.mubr.bf16.mxu1 %v634_v48 }
 0x112   : > { %v525_v54 = vadd.f32 %v524_v51, %v2593_v33  ;;  %922 = vmatmul.mubr.bf16.gmra.mrb[16].mxu1 %v633_v52 }
 0x113   : > { %v575_v55 = vpack.c.bf16 %v523_v50, %v519_v49 }
 0x114   : > { %v576_v56 = vpack.c.bf16 %v525_v54, %v521_v53 }
 0x115   : > { %v615_v57 = vmul.bf16 1009007652, %v575_v55  ;;  %vm595_vm12 = vcmp.gt.bf16.partialorder %v575_v55, 0 }
 0x116   : > { %v528_v58 = vpop.f32.mrb[24].mxu0  ;;  %vm596_vm11 = vcmp.gt.bf16.partialorder %v576_v56, 0  ;;  %v616_v59 = vmul.bf16 1009007652, %v576_v56 }
 0x117   : > { %v530_v60 = vpop.f32.mrb[25].mxu0  ;;  %v529_v63 = vadd.f32 %v528_v58, %v2587_v30  ;;  %v635_v2 = vsel %vm595_vm12, %v575_v55, %v615_v57  ;;  %v2271_v55 = vld [vmem:[%s2863_s5 + $0xf4] ss:$8 sps:$4 sm:$0xff]   ;;  %v2272_v57 = vld [vmem:[%s2865_s7 + $0x40] sm:$0xff]  }
 0x118   : > { %v532_v61 = vpop.f32.mrb[26].mxu0  ;;  %v636_v62 = vsel %vm596_vm11, %v576_v56, %v616_v59  ;;  %v531_v3 = vadd.f32 %v530_v60, %v2593_v33  ;;  %v2269_v56 = vld [vmem:[%s2863_s5 + $0xf0] ss:$8 sps:$4 sm:$0xff]   ;;  %v2273_v58 = vld [vmem:[%s2865_s7] sm:$0xff]   ;;  %2145 = vmatprep.subr.bf16.mxu1 %v2272_v57  ;;  %v2274_v59 = vld [vmem:[%s2865_s7 + $0x48] sm:$0xff]  }
 0x119   : > { %v533_v0 = vadd.f32 %v532_v61, %v2587_v30  ;;  %v534_v1 = vpop.f32.mrb[27].mxu0  ;;  %931 = vmatprep.mubr.bf16.mxu1 %v636_v62  ;;  %2153 = vmatpush3.bf16.msra.mxu1 %v2273_v58  ;;  %v2275_v60 = vld [vmem:[%s2865_s7 + $0x8] sm:$0xff]   ;;  %v2276_v61 = vld [vmem:[%s2865_s7 + $0x50] sm:$0xff]  }
 0x11a   : > { %v535_v4 = vadd.f32 %v534_v1, %v2593_v33  ;;  %932 = vmatmul.mubr.bf16.gmra.mrb[20].mxu1 %v635_v2  ;;  %2146 = vmatprep.subr.bf16.mxu1 %v2274_v59  ;;  %v2277_v62 = vld [vmem:[%s2865_s7 + $0x10] sm:$0xff]   ;;  %v2689_v1 = vld [vmem:[%s2865_s7 + $0x60] sm:$0xff]  }
 0x11b   : > { %v577_v5 = vpack.c.bf16 %v533_v0, %v529_v63  ;;  %v2678_v63 = vld [vmem:[%s2865_s7 + $0x58] sm:$0xff]   ;;  %v2696_v2 = vld [vmem:[%s2865_s7 + $0x20] sm:$0xff]  }
 0x11c   : > { %v578_v6 = vpack.c.bf16 %v535_v4, %v531_v3  ;;  %v2684_v0 = vld [vmem:[%s2865_s7 + $0x18] sm:$0xff]   ;;  %v677_v3 = vld [vmem:[%s2862_s4] sm:$0x3] }
 0x11d   : > { %v617_v7 = vmul.bf16 1009007652, %v577_v5  ;;  %vm597_vm14 = vcmp.gt.bf16.partialorder %v577_v5, 0  ;;  %2154 = vmatpush3.bf16.msra.mxu1 %v2275_v60  ;;  %v2703_v4 = vrot.slane %v677_v3, %v2573_v25 }
 0x11e   : > { %v538_v8 = vpop.f32.mrb[28].mxu0  ;;  %vm598_vm13 = vcmp.gt.bf16.partialorder %v578_v6, 0  ;;  %v618_v9 = vmul.bf16 1009007652, %v578_v6  ;;  %2147 = vmatprep.subr.bf16.mxu1 %v2276_v61 }
 0x11f   : > { %v540_v10 = vpop.f32.mrb[29].mxu0  ;;  %v539_v13 = vadd.f32 %v538_v8, %v2587_v30  ;;  %v637_v16 = vsel %vm597_vm14, %v577_v5, %v617_v7 }
 0x120   : > { %v542_v11 = vpop.f32.mrb[30].mxu0  ;;  %v638_v12 = vsel %vm598_vm13, %v578_v6, %v618_v9  ;;  %v541_v17 = vadd.f32 %v540_v10, %v2593_v33  ;;  %v2706_v6 = vrot.slane %v677_v3, %v2581_v28 }
 0x121   : > { %v543_v14 = vadd.f32 %v542_v11, %v2587_v30  ;;  %v544_v15 = vpop.f32.mrb[31].mxu0  ;;  %941 = vmatprep.mubr.bf16.mxu1 %v638_v12  ;;  %2155 = vmatpush3.bf16.msra.mxu1 %v2277_v62 }
 0x122   : > { %v545_v18 = vadd.f32 %v544_v15, %v2593_v33  ;;  %942 = vmatmul.mubr.bf16.gmra.mrb[24].mxu1 %v637_v16  ;;  %2148 = vmatprep.subr.bf16.mxu1 %v2678_v63 }
 0x123   : > { %v579_v19 = vpack.c.bf16 %v543_v14, %v539_v13 }
 0x124   : > { %v580_v20 = vpack.c.bf16 %v545_v18, %v541_v17 }
 0x125   : > { %v619_v21 = vmul.bf16 1009007652, %v579_v19  ;;  %vm599_vm0 = vcmp.gt.bf16.partialorder %v579_v19, 0  ;;  %2156 = vmatpush3.bf16.msra.mxu1 %v2684_v0 }
 0x126   : > { %v548_v22 = vpop.f32.mrb[32].mxu0  ;;  %vm600_vm15 = vcmp.gt.bf16.partialorder %v580_v20, 0  ;;  %v620_v23 = vmul.bf16 1009007652, %v580_v20  ;;  %2149 = vmatprep.subr.bf16.mxu1 %v2689_v1 }
 0x127   : > { %v550_v24 = vpop.f32.mrb[33].mxu0  ;;  %v549_v29 = vadd.f32 %v548_v22, %v2587_v30  ;;  %v639_v34 = vsel %vm599_vm0, %v579_v19, %v619_v21 }
 0x128   : > { %v552_v26 = vpop.f32.mrb[34].mxu0  ;;  %v640_v27 = vsel %vm600_vm15, %v580_v20, %v620_v23  ;;  %v551_v35 = vadd.f32 %v550_v24, %v2593_v33 }
 0x129   : > { %v553_v31 = vadd.f32 %v552_v26, %v2587_v30  ;;  %v554_v32 = vpop.f32.mrb[35].mxu0  ;;  %951 = vmatprep.mubr.bf16.mxu1 %v640_v27  ;;  %2157 = vmatpush3.bf16.msra.mxu1 %v2696_v2 }
 0x12a   : > { %v555_v36 = vadd.f32 %v554_v32, %v2593_v33  ;;  %952 = vmatmul.mubr.bf16.gmra.mrb[28].mxu1 %v639_v34 }
 0x12b   : > { %v581_v37 = vpack.c.bf16 %v553_v31, %v549_v29 }
 0x12c   : > { %v582_v38 = vpack.c.bf16 %v555_v36, %v551_v35 }
 0x12d   : > { %v621_v39 = vmul.bf16 1009007652, %v581_v37  ;;  %vm601_vm2 = vcmp.gt.bf16.partialorder %v581_v37, 0 }
 0x12e   : > { %v558_v40 = vpop.f32.mrb[36].mxu0  ;;  %vm602_vm1 = vcmp.gt.bf16.partialorder %v582_v38, 0  ;;  %v622_v41 = vmul.bf16 1009007652, %v582_v38 }
 0x12f   : > { %v559_v42 = vadd.f32 %v558_v40, %v2587_v30  ;;  %v560_v43 = vpop.f32.mrb[37].mxu0  ;;  %v641_v48 = vsel %vm601_vm2, %v581_v37, %v621_v39  ;;  %v2266_v30 = vld [vmem:[%s2863_s5 + $0xe0] ss:$8 sps:$4 sm:$0xff]  }
 0x130   : > { %v561_v44 = vadd.f32 %v560_v43, %v2593_v33  ;;  %v642_v45 = vsel %vm602_vm1, %v582_v38, %v622_v41  ;;  %v562_v46 = vpop.f32.mrb[38].mxu0  ;;  %v2268_v33 = vld [vmem:[%s2863_s5 + $0xe4] ss:$8 sps:$4 sm:$0xff]  }
 0x131   : > { %v583_v47 = vpack.c.bf16 %v559_v42, %v559_v42  ;;  %961 = vmatprep.mubr.bf16.mxu1 %v642_v45  ;;  %v563_v49 = vpop.f32.mrb[39].mxu0  ;;  %1292 = vmatprep.subr.bf16.mxu0 %v2268_v33 }
 0x132   : > { %v584_v50 = vpack.c.bf16 %v561_v44, %v561_v44  ;;  %962 = vmatmul.mubr.bf16.gmra.mrb[32].mxu1 %v641_v48  ;;  %1293 = vmatpush1.bf16.msra.mxu0 %v2266_v30 }
 0x133   : > { %v623_v51 = vmul.bf16 1009007652, %v583_v47  ;;  %vm603_vm4 = vcmp.gt.bf16.partialorder %v583_v47, 0  ;;  %1294 = vmatprep.subr.bf16.mxu0 %v2271_v55 }
 0x134   : > { %v624_v52 = vmul.bf16 1009007652, %v584_v50  ;;  %vm604_vm3 = vcmp.gt.bf16.partialorder %v584_v50, 0 }
 0x135   : > { %v643_v54 = vsel %vm603_vm4, %v583_v47, %v623_v51 }
 0x136   : > { %v644_v53 = vsel %vm604_vm3, %v584_v50, %v624_v52  ;;  %1295 = vmatpush1.bf16.msra.mxu0 %v2269_v56 }
 0x137   : > { %971 = vmatprep.mubr.bf16.mxu1 %v644_v53  ;;  %2069 = vmatprep.subr.bf16.mxu0 %v2272_v57 }
 0x13a   : > { %972 = vmatmul.mubr.bf16.gmra.mrb[36].mxu1 %v643_v54 }
 0x1c5   : > { %v883_v5 = vpop.f32.mrb[0].mxu1 }
 0x1c6   : > { %v885_v7 = vpop.f32.mrb[1].mxu1  ;;  %v884_v9 = vadd.f32 %v883_v5, %v2703_v4 }
 0x1c7   : > { %v887_v8 = vpop.f32.mrb[2].mxu1  ;;  %v886_v12 = vadd.f32 %v885_v7, %v2706_v6 }
 0x1c8   : > { %v888_v10 = vadd.f32 %v887_v8, %v2703_v4  ;;  %v889_v11 = vpop.f32.mrb[3].mxu1 }
 0x1c9   : > { %v890_v13 = vadd.f32 %v889_v11, %v2706_v6 }
 0x1ca   : > { %v980_v14 = vpack.c.bf16 %v888_v10, %v884_v9 }
 0x1cb   : > { %v981_v15 = vpack.c.bf16 %v890_v13, %v886_v12 }
 0x1cc   : > { %v1020_v16 = vmul.bf16 1009007652, %v980_v14  ;;  %vm1000_vm5 = vcmp.gt.bf16.partialorder %v980_v14, 0 }
 0x1cd   : > { %v893_v17 = vpop.f32.mrb[4].mxu1  ;;  %vm1001_vm6 = vcmp.gt.bf16.partialorder %v981_v15, 0  ;;  %v1021_v18 = vmul.bf16 1009007652, %v981_v15 }
 0x1ce   : > { %v895_v19 = vpop.f32.mrb[5].mxu1  ;;  %v894_v22 = vadd.f32 %v893_v17, %v2703_v4  ;;  %v1040_v26 = vsel %vm1000_vm5, %v980_v14, %v1020_v16 }
 0x1cf   : > { %v897_v20 = vpop.f32.mrb[6].mxu1  ;;  %v1041_v21 = vsel %vm1001_vm6, %v981_v15, %v1021_v18  ;;  %v896_v27 = vadd.f32 %v895_v19, %v2706_v6 }
 0x1d0   : > { %v898_v23 = vadd.f32 %v897_v20, %v2703_v4  ;;  %v899_v24 = vpop.f32.mrb[7].mxu1  ;;  %1296 = vmatprep.mubr.bf16.mxu0 %v1041_v21 }
 0x1d1   : > { %v900_v29 = vadd.f32 %v899_v24, %v2706_v6  ;;  %1297 = vmatmul.mubr.bf16.vlgmr.msra.gmra.mrb[40].mxu0 %v1040_v26 }
 0x1d2   : > { %v982_v31 = vpack.c.bf16 %v898_v23, %v894_v22  ;;  %2070 = vmatpush3.bf16.msra.mxu0 %v2273_v58 }
 0x1d3   : > { %v983_v32 = vpack.c.bf16 %v900_v29, %v896_v27  ;;  %2071 = vmatprep.subr.bf16.mxu0 %v2274_v59 }
 0x1d4   : > { %v1022_v34 = vmul.bf16 1009007652, %v982_v31  ;;  %vm1002_vm8 = vcmp.gt.bf16.partialorder %v982_v31, 0 }
 0x1d5   : > { %v903_v35 = vpop.f32.mrb[8].mxu1  ;;  %vm1003_vm7 = vcmp.gt.bf16.partialorder %v983_v32, 0  ;;  %v1023_v36 = vmul.bf16 1009007652, %v983_v32 }
 0x1d6   : > { %v905_v37 = vpop.f32.mrb[9].mxu1  ;;  %2072 = vmatpush3.bf16.msra.mxu0 %v2275_v60  ;;  %v904_v40 = vadd.f32 %v903_v35, %v2703_v4  ;;  %v1042_v43 = vsel %vm1002_vm8, %v982_v31, %v1022_v34 }
 0x1d7   : > { %v907_v38 = vpop.f32.mrb[10].mxu1  ;;  %v1043_v39 = vsel %vm1003_vm7, %v983_v32, %v1023_v36  ;;  %2073 = vmatprep.subr.bf16.mxu0 %v2276_v61  ;;  %v906_v44 = vadd.f32 %v905_v37, %v2706_v6 }
 0x1d8   : > { %v908_v41 = vadd.f32 %v907_v38, %v2703_v4  ;;  %v909_v42 = vpop.f32.mrb[11].mxu1  ;;  %1306 = vmatprep.mubr.bf16.mxu0 %v1043_v39 }
 0x1d9   : > { %v910_v45 = vadd.f32 %v909_v42, %v2706_v6  ;;  %1307 = vmatmul.mubr.bf16.gmra.mrb[44].mxu0 %v1042_v43 }
 0x1da   : > { %v984_v46 = vpack.c.bf16 %v908_v41, %v904_v40  ;;  %2074 = vmatpush3.bf16.msra.mxu0 %v2277_v62 }
 0x1db   : > { %v985_v47 = vpack.c.bf16 %v910_v45, %v906_v44  ;;  %2075 = vmatprep.subr.bf16.mxu0 %v2678_v63 }
 0x1dc   : > { %v1024_v48 = vmul.bf16 1009007652, %v984_v46  ;;  %vm1004_vm10 = vcmp.gt.bf16.partialorder %v984_v46, 0 }
 0x1dd   : > { %v913_v49 = vpop.f32.mrb[12].mxu1  ;;  %vm1005_vm9 = vcmp.gt.bf16.partialorder %v985_v47, 0  ;;  %v1025_v50 = vmul.bf16 1009007652, %v985_v47 }
 0x1de   : > { %v915_v51 = vpop.f32.mrb[13].mxu1  ;;  %2076 = vmatpush3.bf16.msra.mxu0 %v2684_v0  ;;  %v914_v54 = vadd.f32 %v913_v49, %v2703_v4  ;;  %v1044_v55 = vsel %vm1004_vm10, %v984_v46, %v1024_v48 }
 0x1df   : > { %v917_v52 = vpop.f32.mrb[14].mxu1  ;;  %v1045_v53 = vsel %vm1005_vm9, %v985_v47, %v1025_v50  ;;  %2077 = vmatprep.subr.bf16.mxu0 %v2689_v1  ;;  %v916_v56 = vadd.f32 %v915_v51, %v2706_v6 }
 0x1e0   : > { %v918_v30 = vadd.f32 %v917_v52, %v2703_v4  ;;  %v919_v33 = vpop.f32.mrb[15].mxu1  ;;  %1316 = vmatprep.mubr.bf16.mxu0 %v1045_v53 }
 0x1e1   : > { %v920_v57 = vadd.f32 %v919_v33, %v2706_v6  ;;  %1317 = vmatmul.mubr.bf16.gmra.mrb[48].mxu0 %v1044_v55 }
 0x1e2   : > { %v986_v58 = vpack.c.bf16 %v918_v30, %v914_v54  ;;  %2078 = vmatpush3.bf16.msra.mxu0 %v2696_v2 }
 0x1e3   : > { %v987_v59 = vpack.c.bf16 %v920_v57, %v916_v56 }
 0x1e4   : > { %v1026_v60 = vmul.bf16 1009007652, %v986_v58  ;;  %vm1006_vm12 = vcmp.gt.bf16.partialorder %v986_v58, 0 }
 0x1e5   : > { %v923_v61 = vpop.f32.mrb[16].mxu1  ;;  %vm1007_vm11 = vcmp.gt.bf16.partialorder %v987_v59, 0  ;;  %v1027_v62 = vmul.bf16 1009007652, %v987_v59 }
 0x1e6   : > { %v925_v63 = vpop.f32.mrb[17].mxu1  ;;  %v924_v3 = vadd.f32 %v923_v61, %v2703_v4  ;;  %v1046_v8 = vsel %vm1006_vm12, %v986_v58, %v1026_v60 }
 0x1e7   : > { %v927_v0 = vpop.f32.mrb[18].mxu1  ;;  %v1047_v1 = vsel %vm1007_vm11, %v987_v59, %v1027_v62  ;;  %v926_v9 = vadd.f32 %v925_v63, %v2706_v6 }
 0x1e8   : > { %v928_v5 = vadd.f32 %v927_v0, %v2703_v4  ;;  %v929_v7 = vpop.f32.mrb[19].mxu1  ;;  %1326 = vmatprep.mubr.bf16.mxu0 %v1047_v1 }
 0x1e9   : > { %v930_v2 = vadd.f32 %v929_v7, %v2706_v6  ;;  %1327 = vmatmul.mubr.bf16.gmra.mrb[52].mxu0 %v1046_v8 }
 0x1ea   : > { %v988_v10 = vpack.c.bf16 %v928_v5, %v924_v3 }
 0x1eb   : > { %v989_v11 = vpack.c.bf16 %v930_v2, %v926_v9 }
 0x1ec   : > { %v1028_v12 = vmul.bf16 1009007652, %v988_v10  ;;  %vm1008_vm14 = vcmp.gt.bf16.partialorder %v988_v10, 0 }
 0x1ed   : > { %v933_v13 = vpop.f32.mrb[20].mxu1  ;;  %vm1009_vm13 = vcmp.gt.bf16.partialorder %v989_v11, 0  ;;  %v1029_v14 = vmul.bf16 1009007652, %v989_v11 }
 0x1ee   : > { %v935_v15 = vpop.f32.mrb[21].mxu1  ;;  %v934_v18 = vadd.f32 %v933_v13, %v2703_v4  ;;  %v1048_v21 = vsel %vm1008_vm14, %v988_v10, %v1028_v12 }
 0x1ef   : > { %v937_v16 = vpop.f32.mrb[22].mxu1  ;;  %v1049_v17 = vsel %vm1009_vm13, %v989_v11, %v1029_v14  ;;  %v936_v22 = vadd.f32 %v935_v15, %v2706_v6 }
 0x1f0   : > { %v938_v19 = vadd.f32 %v937_v16, %v2703_v4  ;;  %v939_v20 = vpop.f32.mrb[23].mxu1  ;;  %1336 = vmatprep.mubr.bf16.mxu0 %v1049_v17 }
 0x1f1   : > { %v940_v23 = vadd.f32 %v939_v20, %v2706_v6  ;;  %1337 = vmatmul.mubr.bf16.gmra.mrb[56].mxu0 %v1048_v21 }
 0x1f2   : > { %v990_v24 = vpack.c.bf16 %v938_v19, %v934_v18 }
 0x1f3   : > { %v991_v26 = vpack.c.bf16 %v940_v23, %v936_v22 }
 0x1f4   : > { %v1030_v27 = vmul.bf16 1009007652, %v990_v24  ;;  %vm1010_vm0 = vcmp.gt.bf16.partialorder %v990_v24, 0 }
 0x1f5   : > { %v943_v29 = vpop.f32.mrb[24].mxu1  ;;  %vm1011_vm15 = vcmp.gt.bf16.partialorder %v991_v26, 0  ;;  %v1031_v31 = vmul.bf16 1009007652, %v991_v26 }
 0x1f6   : > { %v945_v32 = vpop.f32.mrb[25].mxu1  ;;  %v944_v36 = vadd.f32 %v943_v29, %v2703_v4  ;;  %v1050_v39 = vsel %vm1010_vm0, %v990_v24, %v1030_v27  ;;  %v2284_v24 = vld [vmem:[%s2865_s7 + $0x70] sm:$0xff]   ;;  %v2286_v27 = vld [vmem:[%s2865_s7 + $0x78] sm:$0xff]  }
 0x1f7   : > { %v947_v34 = vpop.f32.mrb[26].mxu1  ;;  %v1051_v35 = vsel %vm1011_vm15, %v991_v26, %v1031_v31  ;;  %v946_v40 = vadd.f32 %v945_v32, %v2706_v6  ;;  %v2285_v26 = vld [vmem:[%s2865_s7 + $0x30] sm:$0xff]   ;;  %v2287_v29 = vld [vmem:[%s2865_s7 + $0x38] sm:$0xff]   ;;  %v1092_v31 = vld [vmem:[%s2864_s6] sm:$0x3] }
 0x1f8   : > { %v948_v37 = vadd.f32 %v947_v34, %v2703_v4  ;;  %v949_v38 = vpop.f32.mrb[27].mxu1  ;;  %1346 = vmatprep.mubr.bf16.mxu0 %v1051_v35  ;;  %v2772_v32 = vrot.slane %v1092_v31, %v2573_v25  ;;  %v2775_v35 = vrot.slane %v1092_v31, %v2581_v28 }
 0x1f9   : > { %v950_v41 = vadd.f32 %v949_v38, %v2706_v6  ;;  %1347 = vmatmul.mubr.bf16.gmra.mrb[60].mxu0 %v1050_v39 }
 0x1fa   : > { %v992_v42 = vpack.c.bf16 %v948_v37, %v944_v36 }
 0x1fb   : > { %v993_v43 = vpack.c.bf16 %v950_v41, %v946_v40 }
 0x1fc   : > { %v1032_v44 = vmul.bf16 1009007652, %v992_v42  ;;  %vm1012_vm2 = vcmp.gt.bf16.partialorder %v992_v42, 0 }
 0x1fd   : > { %v953_v45 = vpop.f32.mrb[28].mxu1  ;;  %vm1013_vm1 = vcmp.gt.bf16.partialorder %v993_v43, 0  ;;  %v1033_v46 = vmul.bf16 1009007652, %v993_v43 }
 0x1fe   : > { %v955_v47 = vpop.f32.mrb[29].mxu1  ;;  %v954_v50 = vadd.f32 %v953_v45, %v2703_v4  ;;  %v1052_v53 = vsel %vm1012_vm2, %v992_v42, %v1032_v44 }
 0x1ff   : > { %v957_v48 = vpop.f32.mrb[30].mxu1  ;;  %v1053_v49 = vsel %vm1013_vm1, %v993_v43, %v1033_v46  ;;  %v956_v54 = vadd.f32 %v955_v47, %v2706_v6 }
 0x200   : > { %v958_v51 = vadd.f32 %v957_v48, %v2703_v4  ;;  %v959_v52 = vpop.f32.mrb[31].mxu1  ;;  %1356 = vmatprep.mubr.bf16.mxu0 %v1053_v49 }
 0x201   : > { %v960_v30 = vadd.f32 %v959_v52, %v2706_v6  ;;  %1357 = vmatmul.mubr.bf16.gmra.mrb[64].mxu0 %v1052_v53 }
 0x202   : > { %v994_v33 = vpack.c.bf16 %v958_v51, %v954_v50 }
 0x203   : > { %v995_v55 = vpack.c.bf16 %v960_v30, %v956_v54 }
 0x204   : > { %v1034_v56 = vmul.bf16 1009007652, %v994_v33  ;;  %vm1014_vm4 = vcmp.gt.bf16.partialorder %v994_v33, 0 }
 0x205   : > { %v963_v57 = vpop.f32.mrb[32].mxu1  ;;  %vm1015_vm3 = vcmp.gt.bf16.partialorder %v995_v55, 0  ;;  %v1035_v58 = vmul.bf16 1009007652, %v995_v55 }
 0x206   : > { %v965_v59 = vpop.f32.mrb[33].mxu1  ;;  %v964_v62 = vadd.f32 %v963_v57, %v2703_v4  ;;  %v1054_v1 = vsel %vm1014_vm4, %v994_v33, %v1034_v56 }
 0x207   : > { %v967_v60 = vpop.f32.mrb[34].mxu1  ;;  %v1055_v61 = vsel %vm1015_vm3, %v995_v55, %v1035_v58  ;;  %v966_v3 = vadd.f32 %v965_v59, %v2706_v6 }
 0x208   : > { %v968_v63 = vadd.f32 %v967_v60, %v2703_v4  ;;  %v969_v0 = vpop.f32.mrb[35].mxu1  ;;  %1366 = vmatprep.mubr.bf16.mxu0 %v1055_v61 }
 0x209   : > { %v970_v5 = vadd.f32 %v969_v0, %v2706_v6  ;;  %1367 = vmatmul.mubr.bf16.gmra.mrb[68].mxu0 %v1054_v1 }
 0x20a   : > { %v996_v7 = vpack.c.bf16 %v968_v63, %v964_v62 }
 0x20b   : > { %v997_v8 = vpack.c.bf16 %v970_v5, %v966_v3 }
 0x20c   : > { %v1036_v9 = vmul.bf16 1009007652, %v996_v7  ;;  %vm1016_vm6 = vcmp.gt.bf16.partialorder %v996_v7, 0 }
 0x20d   : > { %v973_v2 = vpop.f32.mrb[36].mxu1  ;;  %vm1017_vm5 = vcmp.gt.bf16.partialorder %v997_v8, 0  ;;  %v1037_v10 = vmul.bf16 1009007652, %v997_v8 }
 0x20e   : > { %v974_v11 = vadd.f32 %v973_v2, %v2703_v4  ;;  %v975_v12 = vpop.f32.mrb[37].mxu1  ;;  %v1056_v18 = vsel %vm1016_vm6, %v996_v7, %v1036_v9  ;;  %v2282_v4 = vld [vmem:[%s2865_s7 + $0x68] sm:$0xff]  }
 0x20f   : > { %v976_v13 = vadd.f32 %v975_v12, %v2706_v6  ;;  %v977_v14 = vpop.f32.mrb[38].mxu1  ;;  %v1057_v15 = vsel %vm1017_vm5, %v997_v8, %v1037_v10  ;;  %v2283_v6 = vld [vmem:[%s2865_s7 + $0x28] sm:$0xff]   ;;  %2079 = vmatprep.subr.bf16.mxu0 %v2282_v4  ;;  %2150 = vmatprep.subr.bf16.mxu1 %v2282_v4 }
 0x210   : > { %v998_v16 = vpack.c.bf16 %v974_v11, %v974_v11  ;;  %v978_v17 = vpop.f32.mrb[39].mxu1  ;;  %1376 = vmatprep.mubr.bf16.mxu0 %v1057_v15  ;;  %2080 = vmatpush3.bf16.msra.mxu0 %v2283_v6 }
 0x211   : > { %v999_v19 = vpack.c.bf16 %v976_v13, %v976_v13  ;;  %1377 = vmatmul.mubr.bf16.gmra.mrb[72].mxu0 %v1056_v18  ;;  %2158 = vmatpush3.bf16.msra.mxu1 %v2283_v6 }
 0x212   : > { %v1038_v21 = vmul.bf16 1009007652, %v998_v16  ;;  %vm1018_vm8 = vcmp.gt.bf16.partialorder %v998_v16, 0  ;;  %2081 = vmatprep.subr.bf16.mxu0 %v2284_v24  ;;  %2151 = vmatprep.subr.bf16.mxu1 %v2284_v24 }
 0x213   : > { %v1039_v20 = vmul.bf16 1009007652, %v999_v19  ;;  %vm1019_vm7 = vcmp.gt.bf16.partialorder %v999_v19, 0 }
 0x214   : > { %v1058_v23 = vsel %vm1018_vm8, %v998_v16, %v1038_v21  ;;  %2082 = vmatpush3.bf16.msra.mxu0 %v2285_v26 }
 0x215   : > { %v1059_v22 = vsel %vm1019_vm7, %v999_v19, %v1039_v20  ;;  %2159 = vmatpush3.bf16.msra.mxu1 %v2285_v26  ;;  %2083 = vmatprep.subr.bf16.mxu0 %v2286_v27 }
 0x216   : > { %1386 = vmatprep.mubr.bf16.mxu0 %v1059_v22  ;;  %2152 = vmatprep.subr.bf16.mxu1 %v2286_v27 }
 0x218   : > { %2084 = vmatpush3.bf16.msra.mxu0 %v2287_v29 }
 0x219   : > { %1387 = vmatmul.mubr.bf16.gmra.mrb[76].mxu0 %v1058_v23  ;;  %2160 = vmatpush3.bf16.msra.mxu1 %v2287_v29 }
 0x2a4   : > { %v1298_v34 = vpop.f32.mrb[40].mxu0 }
 0x2a5   : > { %v1300_v36 = vpop.f32.mrb[41].mxu0  ;;  %v1299_v38 = vadd.f32 %v1298_v34, %v2772_v32 }
 0x2a6   : > { %v1302_v37 = vpop.f32.mrb[42].mxu0  ;;  %v1301_v41 = vadd.f32 %v1300_v36, %v2775_v35 }
 0x2a7   : > { %v1303_v39 = vadd.f32 %v1302_v37, %v2772_v32  ;;  %v1304_v40 = vpop.f32.mrb[43].mxu0 }
 0x2a8   : > { %v1305_v42 = vadd.f32 %v1304_v40, %v2775_v35 }
 0x2a9   : > { %v1395_v43 = vpack.c.bf16 %v1303_v39, %v1299_v38 }
 0x2aa   : > { %v1396_v44 = vpack.c.bf16 %v1305_v42, %v1301_v41 }
 0x2ab   : > { %v1435_v45 = vmul.bf16 1009007652, %v1395_v43  ;;  %vm1415_vm9 = vcmp.gt.bf16.partialorder %v1395_v43, 0 }
 0x2ac   : > { %v1308_v25 = vpop.f32.mrb[44].mxu0  ;;  %vm1416_vm10 = vcmp.gt.bf16.partialorder %v1396_v44, 0  ;;  %v1436_v46 = vmul.bf16 1009007652, %v1396_v44 }
 0x2ad   : > { %v1310_v28 = vpop.f32.mrb[45].mxu0  ;;  %v1309_v49 = vadd.f32 %v1308_v25, %v2772_v32  ;;  %v1455_v52 = vsel %vm1415_vm9, %v1395_v43, %v1435_v45 }
 0x2ae   : > { %v1312_v47 = vpop.f32.mrb[46].mxu0  ;;  %v1456_v48 = vsel %vm1416_vm10, %v1396_v44, %v1436_v46  ;;  %v1311_v53 = vadd.f32 %v1310_v28, %v2775_v35 }
 0x2af   : > { %v1313_v50 = vadd.f32 %v1312_v47, %v2772_v32  ;;  %v1314_v51 = vpop.f32.mrb[47].mxu0  ;;  %1642 = vmatprep.mubr.bf16.mxu0 %v1456_v48 }
 0x2b0   : > { %v1315_v54 = vadd.f32 %v1314_v51, %v2775_v35  ;;  %1643 = vmatmul.mubr.bf16.vlgmr.msra.gmra.mrb[80].mxu0 %v1455_v52 }
 0x2b1   : > { %v1397_v30 = vpack.c.bf16 %v1313_v50, %v1309_v49 }
 0x2b2   : > { %v1398_v33 = vpack.c.bf16 %v1315_v54, %v1311_v53 }
 0x2b3   : > { %v1437_v55 = vmul.bf16 1009007652, %v1397_v30  ;;  %vm1417_vm12 = vcmp.gt.bf16.partialorder %v1397_v30, 0 }
 0x2b4   : > { %v1318_v56 = vpop.f32.mrb[48].mxu0  ;;  %vm1418_vm11 = vcmp.gt.bf16.partialorder %v1398_v33, 0  ;;  %v1438_v57 = vmul.bf16 1009007652, %v1398_v33 }
 0x2b5   : > { %v1320_v58 = vpop.f32.mrb[49].mxu0  ;;  %v1319_v61 = vadd.f32 %v1318_v56, %v2772_v32  ;;  %v1457_v0 = vsel %vm1417_vm12, %v1397_v30, %v1437_v55 }
 0x2b6   : > { %v1322_v59 = vpop.f32.mrb[50].mxu0  ;;  %v1458_v60 = vsel %vm1418_vm11, %v1398_v33, %v1438_v57  ;;  %v1321_v1 = vadd.f32 %v1320_v58, %v2775_v35 }
 0x2b7   : > { %v1323_v62 = vadd.f32 %v1322_v59, %v2772_v32  ;;  %v1324_v63 = vpop.f32.mrb[51].mxu0  ;;  %1650 = vmatprep.mubr.bf16.mxu0 %v1458_v60 }
 0x2b8   : > { %v1325_v3 = vadd.f32 %v1324_v63, %v2775_v35  ;;  %1651 = vmatmul.mubr.bf16.gmra.mrb[84].mxu0 %v1457_v0 }
 0x2b9   : > { %v1399_v5 = vpack.c.bf16 %v1323_v62, %v1319_v61 }
 0x2ba   : > { %v1400_v7 = vpack.c.bf16 %v1325_v3, %v1321_v1 }
 0x2bb   : > { %v1439_v8 = vmul.bf16 1009007652, %v1399_v5  ;;  %vm1419_vm14 = vcmp.gt.bf16.partialorder %v1399_v5, 0 }
 0x2bc   : > { %v1328_v9 = vpop.f32.mrb[52].mxu0  ;;  %vm1420_vm13 = vcmp.gt.bf16.partialorder %v1400_v7, 0  ;;  %v1440_v2 = vmul.bf16 1009007652, %v1400_v7 }
 0x2bd   : > { %v1330_v10 = vpop.f32.mrb[53].mxu0  ;;  %v1329_v13 = vadd.f32 %v1328_v9, %v2772_v32  ;;  %v1459_v16 = vsel %vm1419_vm14, %v1399_v5, %v1439_v8 }
 0x2be   : > { %v1332_v11 = vpop.f32.mrb[54].mxu0  ;;  %v1460_v12 = vsel %vm1420_vm13, %v1400_v7, %v1440_v2  ;;  %v1331_v17 = vadd.f32 %v1330_v10, %v2775_v35 }
 0x2bf   : > { %v1333_v14 = vadd.f32 %v1332_v11, %v2772_v32  ;;  %v1334_v15 = vpop.f32.mrb[55].mxu0  ;;  %1658 = vmatprep.mubr.bf16.mxu0 %v1460_v12 }
 0x2c0   : > { %v1335_v18 = vadd.f32 %v1334_v15, %v2775_v35  ;;  %1659 = vmatmul.mubr.bf16.gmra.mrb[88].mxu0 %v1459_v16 }
 0x2c1   : > { %v1401_v19 = vpack.c.bf16 %v1333_v14, %v1329_v13 }
 0x2c2   : > { %v1402_v20 = vpack.c.bf16 %v1335_v18, %v1331_v17 }
 0x2c3   : > { %v1441_v21 = vmul.bf16 1009007652, %v1401_v19  ;;  %vm1421_vm15 = vcmp.gt.bf16.partialorder %v1401_v19, 0 }
 0x2c4   : > { %v1338_v22 = vpop.f32.mrb[56].mxu0  ;;  %vm1422_vm0 = vcmp.gt.bf16.partialorder %v1402_v20, 0  ;;  %v1442_v23 = vmul.bf16 1009007652, %v1402_v20 }
 0x2c5   : > { %v1340_v4 = vpop.f32.mrb[57].mxu0  ;;  %v1339_v26 = vadd.f32 %v1338_v22, %v2772_v32  ;;  %v1461_v31 = vsel %vm1421_vm15, %v1401_v19, %v1441_v21 }
 0x2c6   : > { %v1342_v6 = vpop.f32.mrb[58].mxu0  ;;  %v1462_v24 = vsel %vm1422_vm0, %v1402_v20, %v1442_v23  ;;  %v1341_v34 = vadd.f32 %v1340_v4, %v2775_v35 }
 0x2c7   : > { %v1343_v27 = vadd.f32 %v1342_v6, %v2772_v32  ;;  %v1344_v29 = vpop.f32.mrb[59].mxu0  ;;  %1666 = vmatprep.mubr.bf16.mxu1 %v1462_v24 }
 0x2c8   : > { %v1345_v36 = vadd.f32 %v1344_v29, %v2775_v35  ;;  %1667 = vmatmul.mubr.bf16.vlgmr.msra.gmra.mrb[40].mxu1 %v1461_v31 }
 0x2c9   : > { %v1403_v37 = vpack.c.bf16 %v1343_v27, %v1339_v26 }
 0x2ca   : > { %v1404_v38 = vpack.c.bf16 %v1345_v36, %v1341_v34 }
 0x2cb   : > { %v1443_v39 = vmul.bf16 1009007652, %v1403_v37  ;;  %vm1423_vm2 = vcmp.gt.bf16.partialorder %v1403_v37, 0 }
 0x2cc   : > { %v1348_v40 = vpop.f32.mrb[60].mxu0  ;;  %vm1424_vm1 = vcmp.gt.bf16.partialorder %v1404_v38, 0  ;;  %v1444_v41 = vmul.bf16 1009007652, %v1404_v38 }
 0x2cd   : > { %v1350_v42 = vpop.f32.mrb[61].mxu0  ;;  %v1349_v45 = vadd.f32 %v1348_v40, %v2772_v32  ;;  %v1463_v28 = vsel %vm1423_vm2, %v1403_v37, %v1443_v39 }
 0x2ce   : > { %v1352_v43 = vpop.f32.mrb[62].mxu0  ;;  %v1464_v44 = vsel %vm1424_vm1, %v1404_v38, %v1444_v41  ;;  %v1351_v47 = vadd.f32 %v1350_v42, %v2775_v35 }
 0x2cf   : > { %v1353_v25 = vadd.f32 %v1352_v43, %v2772_v32  ;;  %v1354_v46 = vpop.f32.mrb[63].mxu0  ;;  %1674 = vmatprep.mubr.bf16.mxu1 %v1464_v44 }
 0x2d0   : > { %v1355_v48 = vadd.f32 %v1354_v46, %v2775_v35  ;;  %1675 = vmatmul.mubr.bf16.gmra.mrb[44].mxu1 %v1463_v28 }
 0x2d1   : > { %v1405_v49 = vpack.c.bf16 %v1353_v25, %v1349_v45 }
 0x2d2   : > { %v1406_v50 = vpack.c.bf16 %v1355_v48, %v1351_v47 }
 0x2d3   : > { %v1445_v51 = vmul.bf16 1009007652, %v1405_v49  ;;  %vm1425_vm4 = vcmp.gt.bf16.partialorder %v1405_v49, 0 }
 0x2d4   : > { %v1358_v52 = vpop.f32.mrb[64].mxu0  ;;  %vm1426_vm3 = vcmp.gt.bf16.partialorder %v1406_v50, 0  ;;  %v1446_v53 = vmul.bf16 1009007652, %v1406_v50 }
 0x2d5   : > { %v1360_v54 = vpop.f32.mrb[65].mxu0  ;;  %v1359_v55 = vadd.f32 %v1358_v52, %v2772_v32  ;;  %v1465_v58 = vsel %vm1425_vm4, %v1405_v49, %v1445_v51  ;;  %v2818_v49 = vld [vmem:[%s2866_s8] ss:$0 sm:$0xff] }
 0x2d6   : > { %v1362_v30 = vpop.f32.mrb[66].mxu0  ;;  %v1466_v33 = vsel %vm1426_vm3, %v1406_v50, %v1446_v53  ;;  %v1361_v59 = vadd.f32 %v1360_v54, %v2775_v35 }
 0x2d7   : > { %v1363_v56 = vadd.f32 %v1362_v30, %v2772_v32  ;;  %v1364_v57 = vpop.f32.mrb[67].mxu0  ;;  %1682 = vmatprep.mubr.bf16.mxu1 %v1466_v33 }
 0x2d8   : > { %v1365_v60 = vadd.f32 %v1364_v57, %v2775_v35  ;;  %1683 = vmatmul.mubr.bf16.gmra.mrb[48].mxu1 %v1465_v58 }
 0x2d9   : > { %v1407_v61 = vpack.c.bf16 %v1363_v56, %v1359_v55 }
 0x2da   : > { %v1408_v62 = vpack.c.bf16 %v1365_v60, %v1361_v59 }
 0x2db   : > { %v1447_v63 = vmul.bf16 1009007652, %v1407_v61  ;;  %vm1427_vm6 = vcmp.gt.bf16.partialorder %v1407_v61, 0 }
 0x2dc   : > { %v1368_v0 = vpop.f32.mrb[68].mxu0  ;;  %vm1428_vm5 = vcmp.gt.bf16.partialorder %v1408_v62, 0  ;;  %v1448_v1 = vmul.bf16 1009007652, %v1408_v62 }
 0x2dd   : > { %v1370_v3 = vpop.f32.mrb[69].mxu0  ;;  %v1369_v8 = vadd.f32 %v1368_v0, %v2772_v32  ;;  %v1467_v10 = vsel %vm1427_vm6, %v1407_v61, %v1447_v63 }
 0x2de   : > { %v1372_v5 = vpop.f32.mrb[70].mxu0  ;;  %v1468_v7 = vsel %vm1428_vm5, %v1408_v62, %v1448_v1  ;;  %v1371_v11 = vadd.f32 %v1370_v3, %v2775_v35 }
 0x2df   : > { %v1373_v9 = vadd.f32 %v1372_v5, %v2772_v32  ;;  %v1374_v2 = vpop.f32.mrb[71].mxu0  ;;  %1690 = vmatprep.mubr.bf16.mxu1 %v1468_v7 }
 0x2e0   : > { %v1375_v12 = vadd.f32 %v1374_v2, %v2775_v35  ;;  %1691 = vmatmul.mubr.bf16.gmra.mrb[52].mxu1 %v1467_v10 }
 0x2e1   : > { %v1409_v13 = vpack.c.bf16 %v1373_v9, %v1369_v8 }
 0x2e2   : > { %v1410_v14 = vpack.c.bf16 %v1375_v12, %v1371_v11 }
 0x2e3   : > { %v1449_v15 = vmul.bf16 1009007652, %v1409_v13  ;;  %vm1429_vm8 = vcmp.gt.bf16.partialorder %v1409_v13, 0 }
 0x2e4   : > { %v1378_v16 = vpop.f32.mrb[72].mxu0  ;;  %vm1430_vm7 = vcmp.gt.bf16.partialorder %v1410_v14, 0  ;;  %v1450_v17 = vmul.bf16 1009007652, %v1410_v14 }
 0x2e5   : > { %v1380_v18 = vpop.f32.mrb[73].mxu0  ;;  %v1379_v21 = vadd.f32 %v1378_v16, %v2772_v32  ;;  %v1469_v4 = vsel %vm1429_vm8, %v1409_v13, %v1449_v15 }
 0x2e6   : > { %v1382_v19 = vpop.f32.mrb[74].mxu0  ;;  %v1470_v20 = vsel %vm1430_vm7, %v1410_v14, %v1450_v17  ;;  %v1381_v6 = vadd.f32 %v1380_v18, %v2775_v35 }
 0x2e7   : > { %v1383_v22 = vadd.f32 %v1382_v19, %v2772_v32  ;;  %v1384_v23 = vpop.f32.mrb[75].mxu0  ;;  %1698 = vmatprep.mubr.bf16.mxu1 %v1470_v20 }
 0x2e8   : > { %v1385_v24 = vadd.f32 %v1384_v23, %v2775_v35  ;;  %1699 = vmatmul.mubr.bf16.gmra.mrb[56].mxu1 %v1469_v4 }
 0x2e9   : > { %v1411_v26 = vpack.c.bf16 %v1383_v22, %v1379_v21 }
 0x2ea   : > { %v1412_v27 = vpack.c.bf16 %v1385_v24, %v1381_v6 }
 0x2eb   : > { %v1451_v29 = vmul.bf16 1009007652, %v1411_v26  ;;  %vm1431_vm10 = vcmp.gt.bf16.partialorder %v1411_v26, 0 }
 0x2ec   : > { %v1388_v31 = vpop.f32.mrb[76].mxu0  ;;  %vm1432_vm9 = vcmp.gt.bf16.partialorder %v1412_v27, 0  ;;  %v1452_v34 = vmul.bf16 1009007652, %v1412_v27 }
 0x2ed   : > { %v1389_v36 = vadd.f32 %v1388_v31, %v2772_v32  ;;  %v1390_v37 = vpop.f32.mrb[77].mxu0  ;;  %v1471_v43 = vsel %vm1431_vm10, %v1411_v26, %v1451_v29 }
 0x2ee   : > { %v1391_v38 = vadd.f32 %v1390_v37, %v2775_v35  ;;  %v1392_v39 = vpop.f32.mrb[78].mxu0  ;;  %v1472_v40 = vsel %vm1432_vm9, %v1412_v27, %v1452_v34 }
 0x2ef   : > { %v1413_v41 = vpack.c.bf16 %v1389_v36, %v1389_v36  ;;  %v1393_v42 = vpop.f32.mrb[79].mxu0  ;;  %1706 = vmatprep.mubr.bf16.mxu1 %v1472_v40 }
 0x2f0   : > { %v1414_v44 = vpack.c.bf16 %v1391_v38, %v1391_v38  ;;  %1707 = vmatmul.mubr.bf16.gmra.mrb[60].mxu1 %v1471_v43 }
 0x2f1   : > { %v1453_v25 = vmul.bf16 1009007652, %v1413_v41  ;;  %vm1433_vm12 = vcmp.gt.bf16.partialorder %v1413_v41, 0 }
 0x2f2   : > { %v1454_v45 = vmul.bf16 1009007652, %v1414_v44  ;;  %vm1434_vm11 = vcmp.gt.bf16.partialorder %v1414_v44, 0 }
 0x2f3   : > { %v1473_v28 = vsel %vm1433_vm12, %v1413_v41, %v1453_v25 }
 0x2f4   : > { %v1474_v46 = vsel %vm1434_vm11, %v1414_v44, %v1454_v45 }
 0x2f5   : > { %1714 = vmatprep.mubr.bf16.mxu1 %v1474_v46 }
 0x2f8   : > { %1715 = vmatmul.mubr.bf16.gmra.mrb[64].mxu1 %v1473_v28 }
 0x383   : > { %v2085_v32 = vpop.f32.mrb[80].mxu0 }
 0x384   : > { %v2086_v47 = vpop.f32.mrb[81].mxu0 }
 0x385   : > { %v2087_v35 = vadd.f32 %v2086_v47, %v2085_v32  ;;  %v2088_v48 = vpop.f32.mrb[82].mxu0 }
 0x386   : > { %v2089_v50 = vpop.f32.mrb[83].mxu0 }
 0x387   : > { %v2090_v51 = vadd.f32 %v2089_v50, %v2088_v48  ;;  %v1645_v52 = vadd.f32 %v2087_v35, %v2818_v49 }
 0x389   : > { %v1648_v53 = vadd.f32 %v2090_v51, %v2818_v49 }
 0x38b   : > { %v2019_v54 = vpack.c.bf16 %v1648_v53, %v1645_v52  ;;  %v2091_v30 = vpop.f32.mrb[84].mxu0 }
 0x38c   : > { %v2092_v33 = vpop.f32.mrb[85].mxu0 }
 0x38d   : > { %2020 = vst [vmem:[%s2826_s26] sm:$0xff] %v2019_v54   ;;  %v2093_v55 = vadd.f32 %v2092_v33, %v2091_v30  ;;  %v2094_v56 = vpop.f32.mrb[86].mxu0 }
 0x38e   : > { %v2095_v57 = vpop.f32.mrb[87].mxu0 }
 0x38f   : > { %v2096_v58 = vadd.f32 %v2095_v57, %v2094_v56  ;;  %v1653_v59 = vadd.f32 %v2093_v55, %v2818_v49 }
 0x391   : > { %v1656_v60 = vadd.f32 %v2096_v58, %v2818_v49 }
 0x393   : > { %v2024_v61 = vpack.c.bf16 %v1656_v60, %v1653_v59  ;;  %v2097_v62 = vpop.f32.mrb[88].mxu0 }
 0x394   : > { %v2098_v63 = vpop.f32.mrb[89].mxu0 }
 0x395   : > { %2061 = vst [vmem:[%s2826_s26 + $0x8] sm:$0xff] %v2024_v61   ;;  %v2099_v0 = vadd.f32 %v2098_v63, %v2097_v62  ;;  %v2100_v1 = vpop.f32.mrb[90].mxu0 }
 0x396   : > { %v2101_v3 = vpop.f32.mrb[91].mxu0 }
 0x397   : > { %v2102_v5 = vadd.f32 %v2101_v3, %v2100_v1  ;;  %v1661_v7 = vadd.f32 %v2099_v0, %v2818_v49 }
 0x399   : > { %v1664_v8 = vadd.f32 %v2102_v5, %v2818_v49 }
 0x39b   : > { %v2029_v9 = vpack.c.bf16 %v1664_v8, %v1661_v7  ;;  %v2103_v2 = vpop.f32.mrb[40].mxu1 }
 0x39c   : > { %v2104_v10 = vpop.f32.mrb[41].mxu1 }
 0x39d   : > { %2062 = vst [vmem:[%s2826_s26 + $0x10] sm:$0xff] %v2029_v9   ;;  %v2105_v11 = vadd.f32 %v2104_v10, %v2103_v2  ;;  %v2106_v12 = vpop.f32.mrb[42].mxu1 }
 0x39e   : > { %v2107_v13 = vpop.f32.mrb[43].mxu1 }
 0x39f   : > { %v2108_v14 = vadd.f32 %v2107_v13, %v2106_v12  ;;  %v1669_v15 = vadd.f32 %v2105_v11, %v2818_v49 }
 0x3a1   : > { %v1672_v16 = vadd.f32 %v2108_v14, %v2818_v49 }
 0x3a3   : > { %v2034_v17 = vpack.c.bf16 %v1672_v16, %v1669_v15  ;;  %v2109_v18 = vpop.f32.mrb[44].mxu1 }
 0x3a4   : > { %v2110_v19 = vpop.f32.mrb[45].mxu1 }
 0x3a5   : > { %2063 = vst [vmem:[%s2826_s26 + $0x18] sm:$0xff] %v2034_v17   ;;  %v2111_v20 = vadd.f32 %v2110_v19, %v2109_v18  ;;  %v2112_v21 = vpop.f32.mrb[46].mxu1 }
 0x3a6   : > { %v2113_v22 = vpop.f32.mrb[47].mxu1 }
 0x3a7   : > { %v2114_v23 = vadd.f32 %v2113_v22, %v2112_v21  ;;  %v1677_v4 = vadd.f32 %v2111_v20, %v2818_v49 }
 0x3a9   : > { %v1680_v6 = vadd.f32 %v2114_v23, %v2818_v49 }
 0x3ab   : > { %v2039_v24 = vpack.c.bf16 %v1680_v6, %v1677_v4  ;;  %v2115_v26 = vpop.f32.mrb[48].mxu1 }
 0x3ac   : > { %v2116_v27 = vpop.f32.mrb[49].mxu1 }
 0x3ad   : > { %2064 = vst [vmem:[%s2826_s26 + $0x20] sm:$0xff] %v2039_v24   ;;  %v2117_v29 = vadd.f32 %v2116_v27, %v2115_v26  ;;  %v2118_v31 = vpop.f32.mrb[50].mxu1 }
 0x3ae   : > { %v2119_v34 = vpop.f32.mrb[51].mxu1 }
 0x3af   : > { %v2120_v36 = vadd.f32 %v2119_v34, %v2118_v31  ;;  %v1685_v37 = vadd.f32 %v2117_v29, %v2818_v49 }
 0x3b1   : > { %v1688_v38 = vadd.f32 %v2120_v36, %v2818_v49 }
 0x3b3   : > { %v2044_v39 = vpack.c.bf16 %v1688_v38, %v1685_v37  ;;  %v2121_v40 = vpop.f32.mrb[52].mxu1 }
 0x3b4   : > { %v2122_v41 = vpop.f32.mrb[53].mxu1 }
 0x3b5   : > { %2065 = vst [vmem:[%s2826_s26 + $0x28] sm:$0xff] %v2044_v39   ;;  %v2123_v42 = vadd.f32 %v2122_v41, %v2121_v40  ;;  %v2124_v43 = vpop.f32.mrb[54].mxu1 }
 0x3b6   : > { %v2125_v44 = vpop.f32.mrb[55].mxu1 }
 0x3b7   : > { %v2126_v45 = vadd.f32 %v2125_v44, %v2124_v43  ;;  %v1693_v25 = vadd.f32 %v2123_v42, %v2818_v49 }
 0x3b9   : > { %v1696_v46 = vadd.f32 %v2126_v45, %v2818_v49 }
 0x3bb   : > { %v2049_v28 = vpack.c.bf16 %v1696_v46, %v1693_v25  ;;  %v2127_v32 = vpop.f32.mrb[56].mxu1 }
 0x3bc   : > { %v2128_v47 = vpop.f32.mrb[57].mxu1 }
 0x3bd   : > { %2066 = vst [vmem:[%s2826_s26 + $0x30] sm:$0xff] %v2049_v28   ;;  %v2129_v35 = vadd.f32 %v2128_v47, %v2127_v32  ;;  %v2130_v48 = vpop.f32.mrb[58].mxu1 }
 0x3be   : > { %v2131_v50 = vpop.f32.mrb[59].mxu1 }
 0x3bf   : > { %v2132_v51 = vadd.f32 %v2131_v50, %v2130_v48  ;;  %v1701_v52 = vadd.f32 %v2129_v35, %v2818_v49 }
 0x3c1   : > { %v1704_v53 = vadd.f32 %v2132_v51, %v2818_v49 }
 0x3c3   : > { %v2054_v54 = vpack.c.bf16 %v1704_v53, %v1701_v52  ;;  %v2133_v30 = vpop.f32.mrb[60].mxu1 }
 0x3c4   : > { %v2134_v33 = vpop.f32.mrb[61].mxu1 }
 0x3c5   : > { %2067 = vst [vmem:[%s2826_s26 + $0x38] sm:$0xff] %v2054_v54   ;;  %v2135_v55 = vadd.f32 %v2134_v33, %v2133_v30  ;;  %v2136_v56 = vpop.f32.mrb[62].mxu1 }
 0x3c6   : > { %v2137_v57 = vpop.f32.mrb[63].mxu1 }
 0x3c7   : > { %v2138_v58 = vadd.f32 %v2137_v57, %v2136_v56  ;;  %v1709_v59 = vadd.f32 %v2135_v55, %v2818_v49 }
 0x3c9   : > { %v1712_v60 = vadd.f32 %v2138_v58, %v2818_v49 }
 0x3cb   : > { %v2059_v61 = vpack.c.bf16 %v1712_v60, %v1709_v59  ;;  %v2139_v62 = vpop.f32.mrb[64].mxu1 }
 0x3cc   : > { %v2140_v63 = vpop.f32.mrb[65].mxu1 }
 0x3cd   : > { %2068 = vst [vmem:[%s2826_s26 + $0x40] sm:$0xff] %v2059_v61   ;;  %v2141_v0 = vadd.f32 %v2140_v63, %v2139_v62  ;;  %v2142_v1 = vpop.f32.mrb[66].mxu1 }
 0x3ce   : > { %v2143_v3 = vpop.f32.mrb[67].mxu1 }
 0x3cf   : > { %v1717_v5 = vadd.f32 %v2141_v0, %v2818_v49 }
 0x3d1   : > { %v2015_v7 = vpack.c.bf16 %v1717_v5, %v1717_v5 }
 0x3d3   : > { %1817 = vst [vmem:[%s2826_s26 + $0x48] sm:$0xf] %v2015_v7 }
 0x3d4 PF: > { %s19_s30 = sadd.s32 1, %s2294_s30  }
 0x3d5   : > { %p16_p4 = scmp.ge.s32.totalorder %s19_s30, 4  }
 0x3d7   :  { %18 = sbr.rel (!%p16_p4) target bundleno = 1 (0x1), region = 86 }

</bundles_post_ra>
